<compile_context>
chip_gen: v7x
topology: tpu7x:2x2x1
jax: 0.10.0
libtpu: 0.0.40
codegen_flags: <defaults>
</compile_context>

<pallas_src>
import functools

import jax
import jax.numpy as jnp
from jax import lax
from jax.experimental import pallas as pl
from jax.experimental.pallas import tpu as pltpu


def _multibox_kernel(targets_ref, priors_ref, loc_ref, conf_ref, out_ref, *,
                     threshold, neg_pos_ratio, var0, var1,
                     num_priors, num_objs, num_classes, block_b):
    O, P, C, Bt = num_objs, num_priors, num_classes, block_b

    # ---- block invariants ---------------------------------------------------
    pr = priors_ref[...]                                     # (8, P)

    def prow(r):                                             # -> (1, 1, P)
        return pr[r:r + 1, :].reshape(1, 1, P)

    px1, py1, px2, py2 = prow(0), prow(1), prow(2), prow(3)  # point form
    p_cx, p_cy, p_w, p_h = prow(4), prow(5), prow(6), prow(7)
    area_p = (px2 - px1) * (py2 - py1)                       # (1, 1, P)

    col_iota = lax.broadcasted_iota(jnp.int32, (1, O, P), 2)
    row_iota = lax.broadcasted_iota(jnp.int32, (1, O, P), 1)
    cls_iota = lax.broadcasted_iota(jnp.int32, (1, C, P), 1)

    def smooth_l1(x):
        a = jnp.abs(x)
        return jnp.where(a < 1.0, 0.5 * x * x, a - 0.5)

    # ---- ground-truth fields for the whole block ----------------------------
    tg = targets_ref[...]                                    # (Bt, O, 5)
    tx1 = tg[:, :, 0:1]                                      # (Bt, O, 1)
    ty1 = tg[:, :, 1:2]
    tx2 = tg[:, :, 2:3]
    ty2 = tg[:, :, 3:4]
    labels = tg[:, :, 4:5]

    # ---------------- jaccard overlaps (Bt, O, P) ----------------------------
    iw = jnp.maximum(jnp.minimum(tx2, px2) - jnp.maximum(tx1, px1), 0.0)
    ih = jnp.maximum(jnp.minimum(ty2, py2) - jnp.maximum(ty1, py1), 0.0)
    inter = iw * ih
    area_t = (tx2 - tx1) * (ty2 - ty1)                       # (Bt, O, 1)
    overlaps = inter / (area_t + area_p - inter)             # (Bt, O, P)

    # best prior per truth / best truth per prior (first index on ties)
    bp_val = jnp.max(overlaps, axis=2, keepdims=True)        # (Bt, O, 1)
    bp_idx = jnp.min(jnp.where(overlaps == bp_val, col_iota, P),
                     axis=2, keepdims=True)                  # (Bt, O, 1)
    bt_val = jnp.max(overlaps, axis=1, keepdims=True)        # (Bt, 1, P)
    bt_idx = jnp.min(jnp.where(overlaps == bt_val, row_iota, O),
                     axis=1, keepdims=True)                  # (Bt, 1, P)

    # index_fill_ + assignment loop: priors claimed as some truth's best
    # prior get overlap 2 and are assigned to that truth (last truth wins).
    match_mat = (bp_idx == col_iota)                         # (Bt, O, P)
    claimed = jnp.max(match_mat.astype(jnp.int32), axis=1, keepdims=True) > 0
    forced_j = jnp.max(jnp.where(match_mat, row_iota, -1), axis=1, keepdims=True)
    bt_idx = jnp.where(claimed, forced_j, bt_idx)            # (Bt, 1, P)
    bt_val = jnp.where(claimed, 2.0, bt_val)

    # gather matched truth boxes / labels along the tiny O axis
    onehot = (bt_idx == row_iota)                            # (Bt, O, P)

    def gather_o(col):                                       # (Bt,O,1)->(Bt,1,P)
        return jnp.sum(jnp.where(onehot, col, 0.0), axis=1, keepdims=True)

    mx1 = gather_o(tx1)
    my1 = gather_o(ty1)
    mx2 = gather_o(tx2)
    my2 = gather_o(ty2)
    conf_lbl = gather_o(labels) + 1.0                        # (Bt, 1, P)
    conf_lbl = jnp.where(bt_val < threshold, 0.0, conf_lbl)
    conf_cls = conf_lbl.astype(jnp.int32)                    # (Bt, 1, P)

    # encode matched boxes with variances
    g_cx = ((mx1 + mx2) * 0.5 - p_cx) / (var0 * p_w)
    g_cy = ((my1 + my2) * 0.5 - p_cy) / (var0 * p_h)
    g_w = jnp.log((mx2 - mx1) / p_w) / var1
    g_h = jnp.log((my2 - my1) / p_h) / var1

    # -------------- localization loss: Smooth L1 on positives ----------------
    lp = loc_ref[...]                                        # (Bt, 4, P)
    sl1 = (smooth_l1(lp[:, 0:1, :] - g_cx) + smooth_l1(lp[:, 1:2, :] - g_cy) +
           smooth_l1(lp[:, 2:3, :] - g_w) + smooth_l1(lp[:, 3:4, :] - g_h))
    loss_l = jnp.sum(jnp.where(conf_cls > 0, sl1, 0.0))      # scalar

    # -------------- confidence loss (per-prior cross-entropy) ----------------
    logits = conf_ref[...]                                   # (Bt, C, P)
    mmax = jnp.max(logits, axis=1, keepdims=True)            # (Bt, 1, P)
    lse = jnp.log(jnp.sum(jnp.exp(logits - mmax), axis=1, keepdims=True)) + mmax
    picked = jnp.sum(jnp.where(cls_iota == conf_cls, logits, 0.0),
                     axis=1, keepdims=True)
    ce3 = lse - picked                                       # (Bt, 1, P), >= 0

    # -------------- hard negative mining: ONE batched bit search -------------
    # pack to a sublane-dense (Bt, P) tile so the 31 passes reduce all images
    # of the block with the same lane reductions.
    ce = ce3.reshape(Bt, P)                                  # (Bt, P)
    cls2 = conf_cls.reshape(Bt, P)                           # (Bt, P)
    pos = cls2 > 0                                           # (Bt, P)
    num_pos_i = jnp.sum(pos.astype(jnp.int32), axis=1, keepdims=True)  # (Bt, 1)
    num_neg = jnp.minimum(neg_pos_ratio * num_pos_i, P - 1)            # (Bt, 1)

    # torch's rank<num_neg (double sort) is replaced by an exact bit-level
    # search for the num_neg-th largest CE value per image.  Non-negative f32
    # bit patterns are monotone so the search is exact; tied values contribute
    # identically, so the summed loss matches the rank-based selection.
    # TODO(synk): assumes ce is finite and >= 0 (degenerate logits / NaN
    # overlaps would break the monotone-bit-pattern assumption).
    lc = jnp.maximum(jnp.where(pos, 0.0, ce), 0.0)           # (Bt, P), >= 0
    lc_bits = pltpu.bitcast(lc, jnp.int32)                   # (Bt, P)
    t_bits = jnp.zeros((Bt, 1), jnp.int32)
    for bit in range(30, -1, -1):                            # 31 per-block passes
        trial = t_bits | jnp.int32(1 << bit)                 # (Bt, 1)
        cnt_ge = jnp.sum((lc_bits >= trial).astype(jnp.int32),
                         axis=1, keepdims=True)              # (Bt, 1)
        t_bits = jnp.where(cnt_ge >= num_neg, trial, t_bits)
    gt_mask = lc_bits > t_bits                               # (Bt, P)
    count_gt = jnp.sum(gt_mask.astype(jnp.int32), axis=1, keepdims=True)
    sum_gt = jnp.sum(jnp.where(gt_mask, lc, 0.0), axis=1, keepdims=True)
    t_val = jnp.max(jnp.where(lc_bits == t_bits, lc, 0.0), axis=1, keepdims=True)
    rem = (num_neg - count_gt).astype(jnp.float32)           # ties to take
    pos_ce = jnp.sum(jnp.where(pos, ce, 0.0), axis=1, keepdims=True)
    loss_c = jnp.sum(pos_ce + sum_gt + rem * t_val)          # scalar
    num_pos_tot = jnp.sum(num_pos_i).astype(jnp.float32)     # scalar

    # packed per-block partial sums, written exactly once per grid step:
    # row0 = loss_l, row1 = loss_c, row2 = num_pos
    out_row = lax.broadcasted_iota(jnp.int32, (1, 8, 128), 1)
    out_ref[...] = jnp.where(out_row == 0, loss_l,
                   jnp.where(out_row == 1, loss_c,
                   jnp.where(out_row == 2, num_pos_tot, 0.0)))


def _pick_batch_block(B, O, P, C):
    """Largest divisor of B that (a) leaves >= 2 grid steps when possible so
    both v7x TensorCores get work, and (b) keeps double-buffered inputs plus a
    rough live-intermediate bound inside a VMEM budget safe on all gens."""
    per_img = 4 * (O * 5 + 4 * P + C * P) + 4 * P * (4 * O + 2 * C)
    cap = max(1, (32 * 1024 * 1024) // per_img)
    limit = min(cap, max(1, B // 2), 8)
    return max(d for d in range(1, B + 1) if B % d == 0 and d <= limit)


def multibox_loss(loc_data, conf_data, priors, targets, *,
                  num_classes, overlap_thresh=0.5, neg_pos=3,
                  variance=(0.1, 0.2), batch_block=None):
    """Pallas-backed MultiBoxLoss forward.

    loc_data:  (B, P, 4) float32
    conf_data: (B, P, C) float32
    priors:    (P, 4)    float32  (cx, cy, w, h)
    targets:   (B, O, 5) float32  (x1, y1, x2, y2, label) — all objects valid
    returns (loss_l, loss_c) scalars.
    """
    B, P, C = conf_data.shape
    O = targets.shape[1]
    assert C == num_classes

    if batch_block is None:
        batch_block = _pick_batch_block(B, O, P, C)
    assert B % batch_block == 0
    num_blocks = B // batch_block

    # transposes stay standalone XLA ops -> contiguous pallas_call input DMA
    loc_t = jnp.transpose(loc_data, (0, 2, 1)).astype(jnp.float32)     # (B,4,P)
    conf_t = jnp.transpose(conf_data, (0, 2, 1)).astype(jnp.float32)   # (B,C,P)
    targets = targets.astype(jnp.float32)

    # sublane-dense (8, P) priors tile: [x1, y1, x2, y2, cx, cy, w, h]
    pr = priors.astype(jnp.float32)
    pf = jnp.concatenate([pr[:, :2] - pr[:, 2:] * 0.5,
                          pr[:, :2] + pr[:, 2:] * 0.5, pr], axis=1)    # (P, 8)
    priors_pack = jnp.transpose(pf, (1, 0))                            # (8, P)

    block_in_bytes = (batch_block * (O * 5 + 4 * P + C * P) + 8 * P) * 4
    vmem_limit = int(min(56 * 1024 * 1024,
                         max(32 * 1024 * 1024, 4 * block_in_bytes)))

    kernel = functools.partial(
        _multibox_kernel,
        threshold=float(overlap_thresh), neg_pos_ratio=int(neg_pos),
        var0=float(variance[0]), var1=float(variance[1]),
        num_priors=P, num_objs=O, num_classes=C, block_b=batch_block)

    out = pl.pallas_call(
        kernel,
        out_shape=jax.ShapeDtypeStruct((num_blocks, 8, 128), jnp.float32),
        grid_spec=pltpu.PrefetchScalarGridSpec(
            num_scalar_prefetch=0,
            grid=(num_blocks,),
            in_specs=[
                pl.BlockSpec((batch_block, O, 5), lambda b: (b, 0, 0)),
                pl.BlockSpec((8, P), lambda b: (0, 0)),
                pl.BlockSpec((batch_block, 4, P), lambda b: (b, 0, 0)),
                pl.BlockSpec((batch_block, C, P), lambda b: (b, 0, 0)),
            ],
            out_specs=pl.BlockSpec((1, 8, 128), lambda b: (b, 0, 0)),
        ),
        compiler_params=pltpu.CompilerParams(
            dimension_semantics=("parallel",),
            vmem_limit_bytes=vmem_limit,
        ),
    )(targets, priors_pack, loc_t, conf_t)

    loss_l = jnp.sum(out[:, 0, 0])
    loss_c = jnp.sum(out[:, 1, 0])
    n = jnp.maximum(jnp.sum(out[:, 2, 0]), 1.0)
    return loss_l / n, loss_c / n


def _reference_multibox_loss(loc_data, conf_data, priors, targets,
                             threshold=0.5, neg_pos=3, variance=(0.1, 0.2)):
    """Plain-JAX reference mirroring the PyTorch semantics."""
    B, P, C = conf_data.shape
    O = targets.shape[1]
    pf = jnp.concatenate([priors[:, :2] - priors[:, 2:] / 2,
                          priors[:, :2] + priors[:, 2:] / 2], axis=1)
    loss_l_tot = jnp.float32(0.0)
    loss_c_tot = jnp.float32(0.0)
    n_tot = jnp.int32(0)
    for b in range(B):
        truths = targets[b, :, :4]
        labels = targets[b, :, 4]
        ix = jnp.maximum(jnp.minimum(truths[:, None, 2], pf[None, :, 2]) -
                         jnp.maximum(truths[:, None, 0], pf[None, :, 0]), 0.0)
        iy = jnp.maximum(jnp.minimum(truths[:, None, 3], pf[None, :, 3]) -
                         jnp.maximum(truths[:, None, 1], pf[None, :, 1]), 0.0)
        inter = ix * iy
        at = ((truths[:, 2] - truths[:, 0]) * (truths[:, 3] - truths[:, 1]))[:, None]
        ap = ((pf[:, 2] - pf[:, 0]) * (pf[:, 3] - pf[:, 1]))[None, :]
        ov = inter / (at + ap - inter)
        bp_idx = jnp.argmax(ov, axis=1)
        bt_val = jnp.max(ov, axis=0)
        bt_idx = jnp.argmax(ov, axis=0)
        bt_val = bt_val.at[bp_idx].set(2.0)
        bt_idx = bt_idx.at[bp_idx].set(jnp.arange(O))
        matches = truths[bt_idx]
        conf = jnp.where(bt_val < threshold, 0.0, labels[bt_idx] + 1.0).astype(jnp.int32)
        g_cxcy = ((matches[:, :2] + matches[:, 2:]) / 2 - priors[:, :2]) / (variance[0] * priors[:, 2:])
        g_wh = jnp.log((matches[:, 2:] - matches[:, :2]) / priors[:, 2:]) / variance[1]
        loc_gt = jnp.concatenate([g_cxcy, g_wh], axis=1)
        pos = conf > 0
        d = loc_data[b] - loc_gt
        sl1 = jnp.where(jnp.abs(d) < 1.0, 0.5 * d * d, jnp.abs(d) - 0.5)
        loss_l_tot += jnp.sum(jnp.where(pos[:, None], sl1, 0.0))
        logits = conf_data[b]
        lse = jax.nn.logsumexp(logits, axis=1)
        picked = jnp.take_along_axis(logits, conf[:, None], axis=1)[:, 0]
        ce = lse - picked
        lc = jnp.where(pos, 0.0, ce)
        order = jnp.argsort(-lc)
        rank = jnp.argsort(order)
        npos = jnp.sum(pos)
        nneg = jnp.minimum(neg_pos * npos, P - 1)
        sel = pos | (rank < nneg)
        loss_c_tot += jnp.sum(jnp.where(sel, ce, 0.0))
        n_tot += npos
    N = jnp.maximum(n_tot.astype(jnp.float32), 1.0)
    return loss_l_tot / N, loss_c_tot / N


if __name__ == "__main__":
    key = jax.random.PRNGKey(0)
    B, P, C, O = 2, 128, 8, 4
    k1, k2, k3, k4, k5, k6, k7 = jax.random.split(key, 7)

    # priors in (cx, cy, w, h)
    p_cxy = jax.random.uniform(k1, (P, 2), minval=0.1, maxval=0.9)
    p_wh = jax.random.uniform(k2, (P, 2), minval=0.05, maxval=0.3)
    priors = jnp.concatenate([p_cxy, p_wh], axis=1).astype(jnp.float32)

    # targets: (B, O, 5) = [x1, y1, x2, y2, label] with valid (x2>x1, y2>y1)
    xy1 = jax.random.uniform(k3, (B, O, 2), minval=0.0, maxval=0.6)
    wh = jax.random.uniform(k4, (B, O, 2), minval=0.05, maxval=0.35)
    xy2 = jnp.minimum(xy1 + wh, 1.0)
    labels = jax.random.randint(k5, (B, O, 1), 0, C - 1).astype(jnp.float32)
    targets = jnp.concatenate([xy1, xy2, labels], axis=-1).astype(jnp.float32)

    loc_data = (0.1 * jax.random.normal(k6, (B, P, 4))).astype(jnp.float32)
    conf_data = jax.random.normal(k7, (B, P, C)).astype(jnp.float32)

    loss_l, loss_c = multibox_loss(loc_data, conf_data, priors, targets,
                                   num_classes=C)
    loss_l, loss_c = jax.block_until_ready((loss_l, loss_c))

    ref_l, ref_c = _reference_multibox_loss(loc_data, conf_data, priors, targets)
    assert bool(jnp.isfinite(loss_l)) and bool(jnp.isfinite(loss_c))
    assert bool(jnp.allclose(loss_l, ref_l, rtol=2e-3, atol=2e-3)), (loss_l, ref_l)
    assert bool(jnp.allclose(loss_c, ref_c, rtol=2e-3, atol=2e-3)), (loss_c, ref_c)
    print("KERNEL_OK")
</pallas_src>

<mosaic_0001>
module attributes {stable_mosaic.version = 11 : i64} {
  func.func @_multibox_kernel(%arg0: i32, %arg1: memref<1x4x5xf32, #tpu.memory_space<vmem>>, %arg2: memref<8x128xf32, #tpu.memory_space<vmem>>, %arg3: memref<1x4x128xf32, #tpu.memory_space<vmem>>, %arg4: memref<1x8x128xf32, #tpu.memory_space<vmem>>, %arg5: memref<1x8x128xf32, #tpu.memory_space<vmem>>) attributes {dimension_semantics = [#tpu.dimension_semantics<parallel>], iteration_bounds = array<i64: 2>, scalar_prefetch = 0 : i64, scratch_operands = 0 : i64, tpu.core_type = #tpu.core_type<tc>, window_params = [{transform_indices = @transform_0, window_bounds = array<i64: 1, 4, 5>}, {pipeline_mode = #tpu.pipeline_mode<synchronous>, transform_indices = @transform_1, window_bounds = array<i64: 8, 128>}, {transform_indices = @transform_2, window_bounds = array<i64: 1, 4, 128>}, {transform_indices = @transform_3, window_bounds = array<i64: 1, 8, 128>}, {transform_indices = @transform_4, window_bounds = array<i64: 1, 8, 128>}]} {
    %c0 = arith.constant 0 : index
    %c0_0 = arith.constant 0 : index
    %0 = vector.load %arg2[%c0, %c0_0] : memref<8x128xf32, #tpu.memory_space<vmem>>, vector<8x128xf32>
    %1 = vector.extract_strided_slice %0 {offsets = [0, 0], sizes = [1, 128], strides = [1, 1]} : vector<8x128xf32> to vector<1x128xf32>
    %2 = vector.shape_cast %1 : vector<1x128xf32> to vector<1x1x128xf32>
    %3 = vector.extract_strided_slice %0 {offsets = [1, 0], sizes = [1, 128], strides = [1, 1]} : vector<8x128xf32> to vector<1x128xf32>
    %4 = vector.shape_cast %3 : vector<1x128xf32> to vector<1x1x128xf32>
    %5 = vector.extract_strided_slice %0 {offsets = [2, 0], sizes = [1, 128], strides = [1, 1]} : vector<8x128xf32> to vector<1x128xf32>
    %6 = vector.shape_cast %5 : vector<1x128xf32> to vector<1x1x128xf32>
    %7 = vector.extract_strided_slice %0 {offsets = [3, 0], sizes = [1, 128], strides = [1, 1]} : vector<8x128xf32> to vector<1x128xf32>
    %8 = vector.shape_cast %7 : vector<1x128xf32> to vector<1x1x128xf32>
    %9 = vector.extract_strided_slice %0 {offsets = [4, 0], sizes = [1, 128], strides = [1, 1]} : vector<8x128xf32> to vector<1x128xf32>
    %10 = vector.shape_cast %9 : vector<1x128xf32> to vector<1x1x128xf32>
    %11 = vector.extract_strided_slice %0 {offsets = [5, 0], sizes = [1, 128], strides = [1, 1]} : vector<8x128xf32> to vector<1x128xf32>
    %12 = vector.shape_cast %11 : vector<1x128xf32> to vector<1x1x128xf32>
    %13 = vector.extract_strided_slice %0 {offsets = [6, 0], sizes = [1, 128], strides = [1, 1]} : vector<8x128xf32> to vector<1x128xf32>
    %14 = vector.shape_cast %13 : vector<1x128xf32> to vector<1x1x128xf32>
    %15 = vector.extract_strided_slice %0 {offsets = [7, 0], sizes = [1, 128], strides = [1, 1]} : vector<8x128xf32> to vector<1x128xf32>
    %16 = vector.shape_cast %15 : vector<1x128xf32> to vector<1x1x128xf32>
    %17 = arith.subf %6, %2 : vector<1x1x128xf32>
    %18 = arith.subf %8, %4 : vector<1x1x128xf32>
    %19 = arith.mulf %17, %18 : vector<1x1x128xf32>
    %20 = tpu.iota {dimensions = array<i32: 2>} : vector<1x4x128xi32>
    %21 = tpu.iota {dimensions = array<i32: 1>} : vector<1x4x128xi32>
    %22 = tpu.iota {dimensions = array<i32: 1>} : vector<1x8x128xi32>
    %c0_1 = arith.constant 0 : index
    %c0_2 = arith.constant 0 : index
    %c0_3 = arith.constant 0 : index
    %23 = vector.load %arg1[%c0_1, %c0_2, %c0_3] : memref<1x4x5xf32, #tpu.memory_space<vmem>>, vector<1x4x5xf32>
    %24 = vector.extract_strided_slice %23 {offsets = [0, 0, 0], sizes = [1, 4, 1], strides = [1, 1, 1]} : vector<1x4x5xf32> to vector<1x4x1xf32>
    %25 = vector.extract_strided_slice %23 {offsets = [0, 0, 1], sizes = [1, 4, 1], strides = [1, 1, 1]} : vector<1x4x5xf32> to vector<1x4x1xf32>
    %26 = vector.extract_strided_slice %23 {offsets = [0, 0, 2], sizes = [1, 4, 1], strides = [1, 1, 1]} : vector<1x4x5xf32> to vector<1x4x1xf32>
    %27 = vector.extract_strided_slice %23 {offsets = [0, 0, 3], sizes = [1, 4, 1], strides = [1, 1, 1]} : vector<1x4x5xf32> to vector<1x4x1xf32>
    %28 = vector.extract_strided_slice %23 {offsets = [0, 0, 4], sizes = [1, 4, 1], strides = [1, 1, 1]} : vector<1x4x5xf32> to vector<1x4x1xf32>
    %29 = vector.broadcast %26 : vector<1x4x1xf32> to vector<1x4x128xf32>
    %30 = vector.broadcast %6 : vector<1x1x128xf32> to vector<1x4x128xf32>
    %31 = arith.minimumf %29, %30 : vector<1x4x128xf32>
    %32 = vector.broadcast %24 : vector<1x4x1xf32> to vector<1x4x128xf32>
    %33 = vector.broadcast %2 : vector<1x1x128xf32> to vector<1x4x128xf32>
    %34 = arith.maximumf %32, %33 : vector<1x4x128xf32>
    %35 = arith.subf %31, %34 : vector<1x4x128xf32>
    %cst = arith.constant 0.000000e+00 : f32
    %36 = vector.broadcast %cst : f32 to vector<1x4x128xf32>
    %37 = arith.maximumf %35, %36 : vector<1x4x128xf32>
    %38 = vector.broadcast %27 : vector<1x4x1xf32> to vector<1x4x128xf32>
    %39 = vector.broadcast %8 : vector<1x1x128xf32> to vector<1x4x128xf32>
    %40 = arith.minimumf %38, %39 : vector<1x4x128xf32>
    %41 = vector.broadcast %25 : vector<1x4x1xf32> to vector<1x4x128xf32>
    %42 = vector.broadcast %4 : vector<1x1x128xf32> to vector<1x4x128xf32>
    %43 = arith.maximumf %41, %42 : vector<1x4x128xf32>
    %44 = arith.subf %40, %43 : vector<1x4x128xf32>
    %cst_4 = arith.constant 0.000000e+00 : f32
    %45 = vector.broadcast %cst_4 : f32 to vector<1x4x128xf32>
    %46 = arith.maximumf %44, %45 : vector<1x4x128xf32>
    %47 = arith.mulf %37, %46 : vector<1x4x128xf32>
    %48 = arith.subf %26, %24 : vector<1x4x1xf32>
    %49 = arith.subf %27, %25 : vector<1x4x1xf32>
    %50 = arith.mulf %48, %49 : vector<1x4x1xf32>
    %51 = vector.broadcast %50 : vector<1x4x1xf32> to vector<1x4x128xf32>
    %52 = vector.broadcast %19 : vector<1x1x128xf32> to vector<1x4x128xf32>
    %53 = arith.addf %51, %52 : vector<1x4x128xf32>
    %54 = arith.subf %53, %47 : vector<1x4x128xf32>
    %55 = arith.divf %47, %54 : vector<1x4x128xf32>
    %cst_5 = arith.constant dense<0xFF800000> : vector<1x4xf32>
    %56 = vector.multi_reduction <maximumf>, %55, %cst_5 [2] : vector<1x4x128xf32> to vector<1x4xf32>
    %57 = vector.shape_cast %56 : vector<1x4xf32> to vector<1x4x1xf32>
    %58 = vector.broadcast %57 : vector<1x4x1xf32> to vector<1x4x128xf32>
    %59 = arith.cmpf oeq, %55, %58 : vector<1x4x128xf32>
    %c128_i32 = arith.constant 128 : i32
    %60 = vector.broadcast %c128_i32 : i32 to vector<1x4x128xi32>
    %61 = arith.select %59, %20, %60 : vector<1x4x128xi1>, vector<1x4x128xi32>
    %cst_6 = arith.constant dense<2147483647> : vector<1x4xi32>
    %62 = vector.multi_reduction <minsi>, %61, %cst_6 [2] : vector<1x4x128xi32> to vector<1x4xi32>
    %63 = vector.shape_cast %62 : vector<1x4xi32> to vector<1x4x1xi32>
    %cst_7 = arith.constant dense<0xFF800000> : vector<1x128xf32>
    %64 = vector.multi_reduction <maximumf>, %55, %cst_7 [1] : vector<1x4x128xf32> to vector<1x128xf32>
    %65 = vector.shape_cast %64 : vector<1x128xf32> to vector<1x1x128xf32>
    %66 = vector.broadcast %65 : vector<1x1x128xf32> to vector<1x4x128xf32>
    %67 = arith.cmpf oeq, %55, %66 : vector<1x4x128xf32>
    %c4_i32 = arith.constant 4 : i32
    %68 = vector.broadcast %c4_i32 : i32 to vector<1x4x128xi32>
    %69 = arith.select %67, %21, %68 : vector<1x4x128xi1>, vector<1x4x128xi32>
    %cst_8 = arith.constant dense<2147483647> : vector<1x128xi32>
    %70 = vector.multi_reduction <minsi>, %69, %cst_8 [1] : vector<1x4x128xi32> to vector<1x128xi32>
    %71 = vector.shape_cast %70 : vector<1x128xi32> to vector<1x1x128xi32>
    %72 = vector.broadcast %63 : vector<1x4x1xi32> to vector<1x4x128xi32>
    %73 = arith.cmpi eq, %72, %20 : vector<1x4x128xi32>
    %74 = arith.extui %73 : vector<1x4x128xi1> to vector<1x4x128xi32>
    %cst_9 = arith.constant dense<-2147483648> : vector<1x128xi32>
    %75 = vector.multi_reduction <maxsi>, %74, %cst_9 [1] : vector<1x4x128xi32> to vector<1x128xi32>
    %76 = vector.shape_cast %75 : vector<1x128xi32> to vector<1x1x128xi32>
    %c0_i32 = arith.constant 0 : i32
    %77 = vector.broadcast %c0_i32 : i32 to vector<1x1x128xi32>
    %78 = arith.cmpi sgt, %76, %77 : vector<1x1x128xi32>
    %c-1_i32 = arith.constant -1 : i32
    %79 = vector.broadcast %c-1_i32 : i32 to vector<1x4x128xi32>
    %80 = arith.select %73, %21, %79 : vector<1x4x128xi1>, vector<1x4x128xi32>
    %cst_10 = arith.constant dense<-2147483648> : vector<1x128xi32>
    %81 = vector.multi_reduction <maxsi>, %80, %cst_10 [1] : vector<1x4x128xi32> to vector<1x128xi32>
    %82 = vector.shape_cast %81 : vector<1x128xi32> to vector<1x1x128xi32>
    %83 = arith.select %78, %82, %71 : vector<1x1x128xi1>, vector<1x1x128xi32>
    %cst_11 = arith.constant 2.000000e+00 : f32
    %84 = vector.broadcast %cst_11 : f32 to vector<1x1x128xf32>
    %85 = arith.select %78, %84, %65 : vector<1x1x128xi1>, vector<1x1x128xf32>
    %86 = vector.broadcast %83 : vector<1x1x128xi32> to vector<1x4x128xi32>
    %87 = arith.cmpi eq, %86, %21 : vector<1x4x128xi32>
    %cst_12 = arith.constant 0.000000e+00 : f32
    %88 = vector.shape_cast %24 : vector<1x4x1xf32> to vector<1x4x1xf32>
    %89 = vector.broadcast %88 : vector<1x4x1xf32> to vector<1x4x128xf32>
    %90 = vector.broadcast %cst_12 : f32 to vector<1x4x128xf32>
    %91 = arith.select %87, %89, %90 : vector<1x4x128xi1>, vector<1x4x128xf32>
    %cst_13 = arith.constant dense<0.000000e+00> : vector<1x128xf32>
    %92 = vector.multi_reduction <add>, %91, %cst_13 [1] : vector<1x4x128xf32> to vector<1x128xf32>
    %93 = vector.shape_cast %92 : vector<1x128xf32> to vector<1x1x128xf32>
    %cst_14 = arith.constant 0.000000e+00 : f32
    %94 = vector.shape_cast %25 : vector<1x4x1xf32> to vector<1x4x1xf32>
    %95 = vector.broadcast %94 : vector<1x4x1xf32> to vector<1x4x128xf32>
    %96 = vector.broadcast %cst_14 : f32 to vector<1x4x128xf32>
    %97 = arith.select %87, %95, %96 : vector<1x4x128xi1>, vector<1x4x128xf32>
    %cst_15 = arith.constant dense<0.000000e+00> : vector<1x128xf32>
    %98 = vector.multi_reduction <add>, %97, %cst_15 [1] : vector<1x4x128xf32> to vector<1x128xf32>
    %99 = vector.shape_cast %98 : vector<1x128xf32> to vector<1x1x128xf32>
    %cst_16 = arith.constant 0.000000e+00 : f32
    %100 = vector.shape_cast %26 : vector<1x4x1xf32> to vector<1x4x1xf32>
    %101 = vector.broadcast %100 : vector<1x4x1xf32> to vector<1x4x128xf32>
    %102 = vector.broadcast %cst_16 : f32 to vector<1x4x128xf32>
    %103 = arith.select %87, %101, %102 : vector<1x4x128xi1>, vector<1x4x128xf32>
    %cst_17 = arith.constant dense<0.000000e+00> : vector<1x128xf32>
    %104 = vector.multi_reduction <add>, %103, %cst_17 [1] : vector<1x4x128xf32> to vector<1x128xf32>
    %105 = vector.shape_cast %104 : vector<1x128xf32> to vector<1x1x128xf32>
    %cst_18 = arith.constant 0.000000e+00 : f32
    %106 = vector.shape_cast %27 : vector<1x4x1xf32> to vector<1x4x1xf32>
    %107 = vector.broadcast %106 : vector<1x4x1xf32> to vector<1x4x128xf32>
    %108 = vector.broadcast %cst_18 : f32 to vector<1x4x128xf32>
    %109 = arith.select %87, %107, %108 : vector<1x4x128xi1>, vector<1x4x128xf32>
    %cst_19 = arith.constant dense<0.000000e+00> : vector<1x128xf32>
    %110 = vector.multi_reduction <add>, %109, %cst_19 [1] : vector<1x4x128xf32> to vector<1x128xf32>
    %111 = vector.shape_cast %110 : vector<1x128xf32> to vector<1x1x128xf32>
    %cst_20 = arith.constant 0.000000e+00 : f32
    %112 = vector.shape_cast %28 : vector<1x4x1xf32> to vector<1x4x1xf32>
    %113 = vector.broadcast %112 : vector<1x4x1xf32> to vector<1x4x128xf32>
    %114 = vector.broadcast %cst_20 : f32 to vector<1x4x128xf32>
    %115 = arith.select %87, %113, %114 : vector<1x4x128xi1>, vector<1x4x128xf32>
    %cst_21 = arith.constant dense<0.000000e+00> : vector<1x128xf32>
    %116 = vector.multi_reduction <add>, %115, %cst_21 [1] : vector<1x4x128xf32> to vector<1x128xf32>
    %117 = vector.shape_cast %116 : vector<1x128xf32> to vector<1x1x128xf32>
    %cst_22 = arith.constant 1.000000e+00 : f32
    %118 = vector.broadcast %cst_22 : f32 to vector<1x1x128xf32>
    %119 = arith.addf %117, %118 : vector<1x1x128xf32>
    %cst_23 = arith.constant 5.000000e-01 : f32
    %120 = vector.broadcast %cst_23 : f32 to vector<1x1x128xf32>
    %121 = arith.cmpf olt, %85, %120 : vector<1x1x128xf32>
    %cst_24 = arith.constant 0.000000e+00 : f32
    %122 = vector.broadcast %cst_24 : f32 to vector<1x1x128xf32>
    %123 = arith.select %121, %122, %119 : vector<1x1x128xi1>, vector<1x1x128xf32>
    %124 = arith.fptosi %123 : vector<1x1x128xf32> to vector<1x1x128xi32>
    %125 = arith.addf %93, %105 : vector<1x1x128xf32>
    %cst_25 = arith.constant 5.000000e-01 : f32
    %126 = vector.broadcast %cst_25 : f32 to vector<1x1x128xf32>
    %127 = arith.mulf %125, %126 : vector<1x1x128xf32>
    %128 = arith.subf %127, %10 : vector<1x1x128xf32>
    %cst_26 = arith.constant 1.000000e-01 : f32
    %129 = vector.broadcast %cst_26 : f32 to vector<1x1x128xf32>
    %130 = arith.mulf %129, %14 : vector<1x1x128xf32>
    %131 = arith.divf %128, %130 : vector<1x1x128xf32>
    %132 = arith.addf %99, %111 : vector<1x1x128xf32>
    %cst_27 = arith.constant 5.000000e-01 : f32
    %133 = vector.broadcast %cst_27 : f32 to vector<1x1x128xf32>
    %134 = arith.mulf %132, %133 : vector<1x1x128xf32>
    %135 = arith.subf %134, %12 : vector<1x1x128xf32>
    %cst_28 = arith.constant 1.000000e-01 : f32
    %136 = vector.broadcast %cst_28 : f32 to vector<1x1x128xf32>
    %137 = arith.mulf %136, %16 : vector<1x1x128xf32>
    %138 = arith.divf %135, %137 : vector<1x1x128xf32>
    %139 = arith.subf %105, %93 : vector<1x1x128xf32>
    %140 = arith.divf %139, %14 : vector<1x1x128xf32>
    %141 = math.log %140 : vector<1x1x128xf32>
    %cst_29 = arith.constant 2.000000e-01 : f32
    %142 = vector.broadcast %cst_29 : f32 to vector<1x1x128xf32>
    %143 = arith.divf %141, %142 : vector<1x1x128xf32>
    %144 = arith.subf %111, %99 : vector<1x1x128xf32>
    %145 = arith.divf %144, %16 : vector<1x1x128xf32>
    %146 = math.log %145 : vector<1x1x128xf32>
    %cst_30 = arith.constant 2.000000e-01 : f32
    %147 = vector.broadcast %cst_30 : f32 to vector<1x1x128xf32>
    %148 = arith.divf %146, %147 : vector<1x1x128xf32>
    %c0_31 = arith.constant 0 : index
    %c0_32 = arith.constant 0 : index
    %c0_33 = arith.constant 0 : index
    %149 = vector.load %arg3[%c0_31, %c0_32, %c0_33] : memref<1x4x128xf32, #tpu.memory_space<vmem>>, vector<1x4x128xf32>
    %150 = vector.extract_strided_slice %149 {offsets = [0, 0, 0], sizes = [1, 1, 128], strides = [1, 1, 1]} : vector<1x4x128xf32> to vector<1x1x128xf32>
    %151 = arith.subf %150, %131 : vector<1x1x128xf32>
    %152 = math.absf %151 : vector<1x1x128xf32>
    %cst_34 = arith.constant 1.000000e+00 : f32
    %153 = vector.broadcast %cst_34 : f32 to vector<1x1x128xf32>
    %154 = arith.cmpf olt, %152, %153 : vector<1x1x128xf32>
    %cst_35 = arith.constant 5.000000e-01 : f32
    %155 = vector.broadcast %cst_35 : f32 to vector<1x1x128xf32>
    %156 = arith.mulf %155, %151 : vector<1x1x128xf32>
    %157 = arith.mulf %156, %151 : vector<1x1x128xf32>
    %cst_36 = arith.constant 5.000000e-01 : f32
    %158 = vector.broadcast %cst_36 : f32 to vector<1x1x128xf32>
    %159 = arith.subf %152, %158 : vector<1x1x128xf32>
    %160 = arith.select %154, %157, %159 : vector<1x1x128xi1>, vector<1x1x128xf32>
    %161 = vector.extract_strided_slice %149 {offsets = [0, 1, 0], sizes = [1, 1, 128], strides = [1, 1, 1]} : vector<1x4x128xf32> to vector<1x1x128xf32>
    %162 = arith.subf %161, %138 : vector<1x1x128xf32>
    %163 = math.absf %162 : vector<1x1x128xf32>
    %cst_37 = arith.constant 1.000000e+00 : f32
    %164 = vector.broadcast %cst_37 : f32 to vector<1x1x128xf32>
    %165 = arith.cmpf olt, %163, %164 : vector<1x1x128xf32>
    %cst_38 = arith.constant 5.000000e-01 : f32
    %166 = vector.broadcast %cst_38 : f32 to vector<1x1x128xf32>
    %167 = arith.mulf %166, %162 : vector<1x1x128xf32>
    %168 = arith.mulf %167, %162 : vector<1x1x128xf32>
    %cst_39 = arith.constant 5.000000e-01 : f32
    %169 = vector.broadcast %cst_39 : f32 to vector<1x1x128xf32>
    %170 = arith.subf %163, %169 : vector<1x1x128xf32>
    %171 = arith.select %165, %168, %170 : vector<1x1x128xi1>, vector<1x1x128xf32>
    %172 = arith.addf %160, %171 : vector<1x1x128xf32>
    %173 = vector.extract_strided_slice %149 {offsets = [0, 2, 0], sizes = [1, 1, 128], strides = [1, 1, 1]} : vector<1x4x128xf32> to vector<1x1x128xf32>
    %174 = arith.subf %173, %143 : vector<1x1x128xf32>
    %175 = math.absf %174 : vector<1x1x128xf32>
    %cst_40 = arith.constant 1.000000e+00 : f32
    %176 = vector.broadcast %cst_40 : f32 to vector<1x1x128xf32>
    %177 = arith.cmpf olt, %175, %176 : vector<1x1x128xf32>
    %cst_41 = arith.constant 5.000000e-01 : f32
    %178 = vector.broadcast %cst_41 : f32 to vector<1x1x128xf32>
    %179 = arith.mulf %178, %174 : vector<1x1x128xf32>
    %180 = arith.mulf %179, %174 : vector<1x1x128xf32>
    %cst_42 = arith.constant 5.000000e-01 : f32
    %181 = vector.broadcast %cst_42 : f32 to vector<1x1x128xf32>
    %182 = arith.subf %175, %181 : vector<1x1x128xf32>
    %183 = arith.select %177, %180, %182 : vector<1x1x128xi1>, vector<1x1x128xf32>
    %184 = arith.addf %172, %183 : vector<1x1x128xf32>
    %185 = vector.extract_strided_slice %149 {offsets = [0, 3, 0], sizes = [1, 1, 128], strides = [1, 1, 1]} : vector<1x4x128xf32> to vector<1x1x128xf32>
    %186 = arith.subf %185, %148 : vector<1x1x128xf32>
    %187 = math.absf %186 : vector<1x1x128xf32>
    %cst_43 = arith.constant 1.000000e+00 : f32
    %188 = vector.broadcast %cst_43 : f32 to vector<1x1x128xf32>
    %189 = arith.cmpf olt, %187, %188 : vector<1x1x128xf32>
    %cst_44 = arith.constant 5.000000e-01 : f32
    %190 = vector.broadcast %cst_44 : f32 to vector<1x1x128xf32>
    %191 = arith.mulf %190, %186 : vector<1x1x128xf32>
    %192 = arith.mulf %191, %186 : vector<1x1x128xf32>
    %cst_45 = arith.constant 5.000000e-01 : f32
    %193 = vector.broadcast %cst_45 : f32 to vector<1x1x128xf32>
    %194 = arith.subf %187, %193 : vector<1x1x128xf32>
    %195 = arith.select %189, %192, %194 : vector<1x1x128xi1>, vector<1x1x128xf32>
    %196 = arith.addf %184, %195 : vector<1x1x128xf32>
    %c0_i32_46 = arith.constant 0 : i32
    %197 = vector.broadcast %c0_i32_46 : i32 to vector<1x1x128xi32>
    %198 = arith.cmpi sgt, %124, %197 : vector<1x1x128xi32>
    %cst_47 = arith.constant 0.000000e+00 : f32
    %199 = vector.broadcast %cst_47 : f32 to vector<1x1x128xf32>
    %200 = arith.select %198, %196, %199 : vector<1x1x128xi1>, vector<1x1x128xf32>
    %201 = vector.shape_cast %200 : vector<1x1x128xf32> to vector<1x1x1x128xf32>
    %cst_48 = arith.constant dense<0.000000e+00> : vector<1xf32>
    %202 = vector.multi_reduction <add>, %201, %cst_48 [1, 2, 3] : vector<1x1x1x128xf32> to vector<1xf32>
    %203 = vector.shape_cast %202 : vector<1xf32> to vector<1x1x1x1xf32>
    %204 = vector.extract %203[0, 0, 0, 0] : f32 from vector<1x1x1x1xf32>
    %c0_49 = arith.constant 0 : index
    %c0_50 = arith.constant 0 : index
    %c0_51 = arith.constant 0 : index
    %205 = vector.load %arg4[%c0_49, %c0_50, %c0_51] : memref<1x8x128xf32, #tpu.memory_space<vmem>>, vector<1x8x128xf32>
    %cst_52 = arith.constant dense<0xFF800000> : vector<1x128xf32>
    %206 = vector.multi_reduction <maximumf>, %205, %cst_52 [1] : vector<1x8x128xf32> to vector<1x128xf32>
    %207 = vector.shape_cast %206 : vector<1x128xf32> to vector<1x1x128xf32>
    %208 = vector.broadcast %207 : vector<1x1x128xf32> to vector<1x8x128xf32>
    %209 = arith.subf %205, %208 : vector<1x8x128xf32>
    %210 = math.exp %209 : vector<1x8x128xf32>
    %cst_53 = arith.constant dense<0.000000e+00> : vector<1x128xf32>
    %211 = vector.multi_reduction <add>, %210, %cst_53 [1] : vector<1x8x128xf32> to vector<1x128xf32>
    %212 = vector.shape_cast %211 : vector<1x128xf32> to vector<1x1x128xf32>
    %213 = math.log %212 : vector<1x1x128xf32>
    %214 = arith.addf %213, %207 : vector<1x1x128xf32>
    %215 = vector.broadcast %124 : vector<1x1x128xi32> to vector<1x8x128xi32>
    %216 = arith.cmpi eq, %22, %215 : vector<1x8x128xi32>
    %cst_54 = arith.constant 0.000000e+00 : f32
    %217 = vector.broadcast %cst_54 : f32 to vector<1x8x128xf32>
    %218 = arith.select %216, %205, %217 : vector<1x8x128xi1>, vector<1x8x128xf32>
    %cst_55 = arith.constant dense<0.000000e+00> : vector<1x128xf32>
    %219 = vector.multi_reduction <add>, %218, %cst_55 [1] : vector<1x8x128xf32> to vector<1x128xf32>
    %220 = vector.shape_cast %219 : vector<1x128xf32> to vector<1x1x128xf32>
    %221 = arith.subf %214, %220 : vector<1x1x128xf32>
    %222 = vector.shape_cast %221 : vector<1x1x128xf32> to vector<1x128xf32>
    %223 = vector.shape_cast %124 : vector<1x1x128xi32> to vector<1x128xi32>
    %c0_i32_56 = arith.constant 0 : i32
    %224 = vector.broadcast %c0_i32_56 : i32 to vector<1x128xi32>
    %225 = arith.cmpi sgt, %223, %224 : vector<1x128xi32>
    %226 = arith.extui %225 : vector<1x128xi1> to vector<1x128xi32>
    %cst_57 = arith.constant dense<0> : vector<1xi32>
    %227 = vector.multi_reduction <add>, %226, %cst_57 [1] : vector<1x128xi32> to vector<1xi32>
    %228 = vector.shape_cast %227 : vector<1xi32> to vector<1x1xi32>
    %c3_i32 = arith.constant 3 : i32
    %229 = vector.broadcast %c3_i32 : i32 to vector<1x1xi32>
    %230 = arith.muli %229, %228 : vector<1x1xi32>
    %c127_i32 = arith.constant 127 : i32
    %231 = vector.broadcast %c127_i32 : i32 to vector<1x1xi32>
    %232 = arith.minsi %230, %231 : vector<1x1xi32>
    %cst_58 = arith.constant 0.000000e+00 : f32
    %233 = vector.broadcast %cst_58 : f32 to vector<1x128xf32>
    %234 = arith.select %225, %233, %222 : vector<1x128xi1>, vector<1x128xf32>
    %cst_59 = arith.constant 0.000000e+00 : f32
    %235 = vector.broadcast %cst_59 : f32 to vector<1x128xf32>
    %236 = arith.maximumf %234, %235 : vector<1x128xf32>
    %237 = tpu.bitcast %236 : vector<1x128xf32> -> vector<1x128xi32>
    %c0_i32_60 = arith.constant 0 : i32
    %238 = vector.broadcast %c0_i32_60 : i32 to vector<1x1xi32>
    %c1073741824_i32 = arith.constant 1073741824 : i32
    %239 = vector.broadcast %c1073741824_i32 : i32 to vector<1x1xi32>
    %240 = arith.ori %238, %239 : vector<1x1xi32>
    %241 = vector.broadcast %240 : vector<1x1xi32> to vector<1x128xi32>
    %242 = arith.cmpi sge, %237, %241 : vector<1x128xi32>
    %243 = arith.extui %242 : vector<1x128xi1> to vector<1x128xi32>
    %cst_61 = arith.constant dense<0> : vector<1xi32>
    %244 = vector.multi_reduction <add>, %243, %cst_61 [1] : vector<1x128xi32> to vector<1xi32>
    %245 = vector.shape_cast %244 : vector<1xi32> to vector<1x1xi32>
    %246 = arith.cmpi sge, %245, %232 : vector<1x1xi32>
    %247 = arith.select %246, %240, %238 : vector<1x1xi1>, vector<1x1xi32>
    %c536870912_i32 = arith.constant 536870912 : i32
    %248 = vector.broadcast %c536870912_i32 : i32 to vector<1x1xi32>
    %249 = arith.ori %247, %248 : vector<1x1xi32>
    %250 = vector.broadcast %249 : vector<1x1xi32> to vector<1x128xi32>
    %251 = arith.cmpi sge, %237, %250 : vector<1x128xi32>
    %252 = arith.extui %251 : vector<1x128xi1> to vector<1x128xi32>
    %cst_62 = arith.constant dense<0> : vector<1xi32>
    %253 = vector.multi_reduction <add>, %252, %cst_62 [1] : vector<1x128xi32> to vector<1xi32>
    %254 = vector.shape_cast %253 : vector<1xi32> to vector<1x1xi32>
    %255 = arith.cmpi sge, %254, %232 : vector<1x1xi32>
    %256 = arith.select %255, %249, %247 : vector<1x1xi1>, vector<1x1xi32>
    %c268435456_i32 = arith.constant 268435456 : i32
    %257 = vector.broadcast %c268435456_i32 : i32 to vector<1x1xi32>
    %258 = arith.ori %256, %257 : vector<1x1xi32>
    %259 = vector.broadcast %258 : vector<1x1xi32> to vector<1x128xi32>
    %260 = arith.cmpi sge, %237, %259 : vector<1x128xi32>
    %261 = arith.extui %260 : vector<1x128xi1> to vector<1x128xi32>
    %cst_63 = arith.constant dense<0> : vector<1xi32>
    %262 = vector.multi_reduction <add>, %261, %cst_63 [1] : vector<1x128xi32> to vector<1xi32>
    %263 = vector.shape_cast %262 : vector<1xi32> to vector<1x1xi32>
    %264 = arith.cmpi sge, %263, %232 : vector<1x1xi32>
    %265 = arith.select %264, %258, %256 : vector<1x1xi1>, vector<1x1xi32>
    %c134217728_i32 = arith.constant 134217728 : i32
    %266 = vector.broadcast %c134217728_i32 : i32 to vector<1x1xi32>
    %267 = arith.ori %265, %266 : vector<1x1xi32>
    %268 = vector.broadcast %267 : vector<1x1xi32> to vector<1x128xi32>
    %269 = arith.cmpi sge, %237, %268 : vector<1x128xi32>
    %270 = arith.extui %269 : vector<1x128xi1> to vector<1x128xi32>
    %cst_64 = arith.constant dense<0> : vector<1xi32>
    %271 = vector.multi_reduction <add>, %270, %cst_64 [1] : vector<1x128xi32> to vector<1xi32>
    %272 = vector.shape_cast %271 : vector<1xi32> to vector<1x1xi32>
    %273 = arith.cmpi sge, %272, %232 : vector<1x1xi32>
    %274 = arith.select %273, %267, %265 : vector<1x1xi1>, vector<1x1xi32>
    %c67108864_i32 = arith.constant 67108864 : i32
    %275 = vector.broadcast %c67108864_i32 : i32 to vector<1x1xi32>
    %276 = arith.ori %274, %275 : vector<1x1xi32>
    %277 = vector.broadcast %276 : vector<1x1xi32> to vector<1x128xi32>
    %278 = arith.cmpi sge, %237, %277 : vector<1x128xi32>
    %279 = arith.extui %278 : vector<1x128xi1> to vector<1x128xi32>
    %cst_65 = arith.constant dense<0> : vector<1xi32>
    %280 = vector.multi_reduction <add>, %279, %cst_65 [1] : vector<1x128xi32> to vector<1xi32>
    %281 = vector.shape_cast %280 : vector<1xi32> to vector<1x1xi32>
    %282 = arith.cmpi sge, %281, %232 : vector<1x1xi32>
    %283 = arith.select %282, %276, %274 : vector<1x1xi1>, vector<1x1xi32>
    %c33554432_i32 = arith.constant 33554432 : i32
    %284 = vector.broadcast %c33554432_i32 : i32 to vector<1x1xi32>
    %285 = arith.ori %283, %284 : vector<1x1xi32>
    %286 = vector.broadcast %285 : vector<1x1xi32> to vector<1x128xi32>
    %287 = arith.cmpi sge, %237, %286 : vector<1x128xi32>
    %288 = arith.extui %287 : vector<1x128xi1> to vector<1x128xi32>
    %cst_66 = arith.constant dense<0> : vector<1xi32>
    %289 = vector.multi_reduction <add>, %288, %cst_66 [1] : vector<1x128xi32> to vector<1xi32>
    %290 = vector.shape_cast %289 : vector<1xi32> to vector<1x1xi32>
    %291 = arith.cmpi sge, %290, %232 : vector<1x1xi32>
    %292 = arith.select %291, %285, %283 : vector<1x1xi1>, vector<1x1xi32>
    %c16777216_i32 = arith.constant 16777216 : i32
    %293 = vector.broadcast %c16777216_i32 : i32 to vector<1x1xi32>
    %294 = arith.ori %292, %293 : vector<1x1xi32>
    %295 = vector.broadcast %294 : vector<1x1xi32> to vector<1x128xi32>
    %296 = arith.cmpi sge, %237, %295 : vector<1x128xi32>
    %297 = arith.extui %296 : vector<1x128xi1> to vector<1x128xi32>
    %cst_67 = arith.constant dense<0> : vector<1xi32>
    %298 = vector.multi_reduction <add>, %297, %cst_67 [1] : vector<1x128xi32> to vector<1xi32>
    %299 = vector.shape_cast %298 : vector<1xi32> to vector<1x1xi32>
    %300 = arith.cmpi sge, %299, %232 : vector<1x1xi32>
    %301 = arith.select %300, %294, %292 : vector<1x1xi1>, vector<1x1xi32>
    %c8388608_i32 = arith.constant 8388608 : i32
    %302 = vector.broadcast %c8388608_i32 : i32 to vector<1x1xi32>
    %303 = arith.ori %301, %302 : vector<1x1xi32>
    %304 = vector.broadcast %303 : vector<1x1xi32> to vector<1x128xi32>
    %305 = arith.cmpi sge, %237, %304 : vector<1x128xi32>
    %306 = arith.extui %305 : vector<1x128xi1> to vector<1x128xi32>
    %cst_68 = arith.constant dense<0> : vector<1xi32>
    %307 = vector.multi_reduction <add>, %306, %cst_68 [1] : vector<1x128xi32> to vector<1xi32>
    %308 = vector.shape_cast %307 : vector<1xi32> to vector<1x1xi32>
    %309 = arith.cmpi sge, %308, %232 : vector<1x1xi32>
    %310 = arith.select %309, %303, %301 : vector<1x1xi1>, vector<1x1xi32>
    %c4194304_i32 = arith.constant 4194304 : i32
    %311 = vector.broadcast %c4194304_i32 : i32 to vector<1x1xi32>
    %312 = arith.ori %310, %311 : vector<1x1xi32>
    %313 = vector.broadcast %312 : vector<1x1xi32> to vector<1x128xi32>
    %314 = arith.cmpi sge, %237, %313 : vector<1x128xi32>
    %315 = arith.extui %314 : vector<1x128xi1> to vector<1x128xi32>
    %cst_69 = arith.constant dense<0> : vector<1xi32>
    %316 = vector.multi_reduction <add>, %315, %cst_69 [1] : vector<1x128xi32> to vector<1xi32>
    %317 = vector.shape_cast %316 : vector<1xi32> to vector<1x1xi32>
    %318 = arith.cmpi sge, %317, %232 : vector<1x1xi32>
    %319 = arith.select %318, %312, %310 : vector<1x1xi1>, vector<1x1xi32>
    %c2097152_i32 = arith.constant 2097152 : i32
    %320 = vector.broadcast %c2097152_i32 : i32 to vector<1x1xi32>
    %321 = arith.ori %319, %320 : vector<1x1xi32>
    %322 = vector.broadcast %321 : vector<1x1xi32> to vector<1x128xi32>
    %323 = arith.cmpi sge, %237, %322 : vector<1x128xi32>
    %324 = arith.extui %323 : vector<1x128xi1> to vector<1x128xi32>
    %cst_70 = arith.constant dense<0> : vector<1xi32>
    %325 = vector.multi_reduction <add>, %324, %cst_70 [1] : vector<1x128xi32> to vector<1xi32>
    %326 = vector.shape_cast %325 : vector<1xi32> to vector<1x1xi32>
    %327 = arith.cmpi sge, %326, %232 : vector<1x1xi32>
    %328 = arith.select %327, %321, %319 : vector<1x1xi1>, vector<1x1xi32>
    %c1048576_i32 = arith.constant 1048576 : i32
    %329 = vector.broadcast %c1048576_i32 : i32 to vector<1x1xi32>
    %330 = arith.ori %328, %329 : vector<1x1xi32>
    %331 = vector.broadcast %330 : vector<1x1xi32> to vector<1x128xi32>
    %332 = arith.cmpi sge, %237, %331 : vector<1x128xi32>
    %333 = arith.extui %332 : vector<1x128xi1> to vector<1x128xi32>
    %cst_71 = arith.constant dense<0> : vector<1xi32>
    %334 = vector.multi_reduction <add>, %333, %cst_71 [1] : vector<1x128xi32> to vector<1xi32>
    %335 = vector.shape_cast %334 : vector<1xi32> to vector<1x1xi32>
    %336 = arith.cmpi sge, %335, %232 : vector<1x1xi32>
    %337 = arith.select %336, %330, %328 : vector<1x1xi1>, vector<1x1xi32>
    %c524288_i32 = arith.constant 524288 : i32
    %338 = vector.broadcast %c524288_i32 : i32 to vector<1x1xi32>
    %339 = arith.ori %337, %338 : vector<1x1xi32>
    %340 = vector.broadcast %339 : vector<1x1xi32> to vector<1x128xi32>
    %341 = arith.cmpi sge, %237, %340 : vector<1x128xi32>
    %342 = arith.extui %341 : vector<1x128xi1> to vector<1x128xi32>
    %cst_72 = arith.constant dense<0> : vector<1xi32>
    %343 = vector.multi_reduction <add>, %342, %cst_72 [1] : vector<1x128xi32> to vector<1xi32>
    %344 = vector.shape_cast %343 : vector<1xi32> to vector<1x1xi32>
    %345 = arith.cmpi sge, %344, %232 : vector<1x1xi32>
    %346 = arith.select %345, %339, %337 : vector<1x1xi1>, vector<1x1xi32>
    %c262144_i32 = arith.constant 262144 : i32
    %347 = vector.broadcast %c262144_i32 : i32 to vector<1x1xi32>
    %348 = arith.ori %346, %347 : vector<1x1xi32>
    %349 = vector.broadcast %348 : vector<1x1xi32> to vector<1x128xi32>
    %350 = arith.cmpi sge, %237, %349 : vector<1x128xi32>
    %351 = arith.extui %350 : vector<1x128xi1> to vector<1x128xi32>
    %cst_73 = arith.constant dense<0> : vector<1xi32>
    %352 = vector.multi_reduction <add>, %351, %cst_73 [1] : vector<1x128xi32> to vector<1xi32>
    %353 = vector.shape_cast %352 : vector<1xi32> to vector<1x1xi32>
    %354 = arith.cmpi sge, %353, %232 : vector<1x1xi32>
    %355 = arith.select %354, %348, %346 : vector<1x1xi1>, vector<1x1xi32>
    %c131072_i32 = arith.constant 131072 : i32
    %356 = vector.broadcast %c131072_i32 : i32 to vector<1x1xi32>
    %357 = arith.ori %355, %356 : vector<1x1xi32>
    %358 = vector.broadcast %357 : vector<1x1xi32> to vector<1x128xi32>
    %359 = arith.cmpi sge, %237, %358 : vector<1x128xi32>
    %360 = arith.extui %359 : vector<1x128xi1> to vector<1x128xi32>
    %cst_74 = arith.constant dense<0> : vector<1xi32>
    %361 = vector.multi_reduction <add>, %360, %cst_74 [1] : vector<1x128xi32> to vector<1xi32>
    %362 = vector.shape_cast %361 : vector<1xi32> to vector<1x1xi32>
    %363 = arith.cmpi sge, %362, %232 : vector<1x1xi32>
    %364 = arith.select %363, %357, %355 : vector<1x1xi1>, vector<1x1xi32>
    %c65536_i32 = arith.constant 65536 : i32
    %365 = vector.broadcast %c65536_i32 : i32 to vector<1x1xi32>
    %366 = arith.ori %364, %365 : vector<1x1xi32>
    %367 = vector.broadcast %366 : vector<1x1xi32> to vector<1x128xi32>
    %368 = arith.cmpi sge, %237, %367 : vector<1x128xi32>
    %369 = arith.extui %368 : vector<1x128xi1> to vector<1x128xi32>
    %cst_75 = arith.constant dense<0> : vector<1xi32>
    %370 = vector.multi_reduction <add>, %369, %cst_75 [1] : vector<1x128xi32> to vector<1xi32>
    %371 = vector.shape_cast %370 : vector<1xi32> to vector<1x1xi32>
    %372 = arith.cmpi sge, %371, %232 : vector<1x1xi32>
    %373 = arith.select %372, %366, %364 : vector<1x1xi1>, vector<1x1xi32>
    %c32768_i32 = arith.constant 32768 : i32
    %374 = vector.broadcast %c32768_i32 : i32 to vector<1x1xi32>
    %375 = arith.ori %373, %374 : vector<1x1xi32>
    %376 = vector.broadcast %375 : vector<1x1xi32> to vector<1x128xi32>
    %377 = arith.cmpi sge, %237, %376 : vector<1x128xi32>
    %378 = arith.extui %377 : vector<1x128xi1> to vector<1x128xi32>
    %cst_76 = arith.constant dense<0> : vector<1xi32>
    %379 = vector.multi_reduction <add>, %378, %cst_76 [1] : vector<1x128xi32> to vector<1xi32>
    %380 = vector.shape_cast %379 : vector<1xi32> to vector<1x1xi32>
    %381 = arith.cmpi sge, %380, %232 : vector<1x1xi32>
    %382 = arith.select %381, %375, %373 : vector<1x1xi1>, vector<1x1xi32>
    %c16384_i32 = arith.constant 16384 : i32
    %383 = vector.broadcast %c16384_i32 : i32 to vector<1x1xi32>
    %384 = arith.ori %382, %383 : vector<1x1xi32>
    %385 = vector.broadcast %384 : vector<1x1xi32> to vector<1x128xi32>
    %386 = arith.cmpi sge, %237, %385 : vector<1x128xi32>
    %387 = arith.extui %386 : vector<1x128xi1> to vector<1x128xi32>
    %cst_77 = arith.constant dense<0> : vector<1xi32>
    %388 = vector.multi_reduction <add>, %387, %cst_77 [1] : vector<1x128xi32> to vector<1xi32>
    %389 = vector.shape_cast %388 : vector<1xi32> to vector<1x1xi32>
    %390 = arith.cmpi sge, %389, %232 : vector<1x1xi32>
    %391 = arith.select %390, %384, %382 : vector<1x1xi1>, vector<1x1xi32>
    %c8192_i32 = arith.constant 8192 : i32
    %392 = vector.broadcast %c8192_i32 : i32 to vector<1x1xi32>
    %393 = arith.ori %391, %392 : vector<1x1xi32>
    %394 = vector.broadcast %393 : vector<1x1xi32> to vector<1x128xi32>
    %395 = arith.cmpi sge, %237, %394 : vector<1x128xi32>
    %396 = arith.extui %395 : vector<1x128xi1> to vector<1x128xi32>
    %cst_78 = arith.constant dense<0> : vector<1xi32>
    %397 = vector.multi_reduction <add>, %396, %cst_78 [1] : vector<1x128xi32> to vector<1xi32>
    %398 = vector.shape_cast %397 : vector<1xi32> to vector<1x1xi32>
    %399 = arith.cmpi sge, %398, %232 : vector<1x1xi32>
    %400 = arith.select %399, %393, %391 : vector<1x1xi1>, vector<1x1xi32>
    %c4096_i32 = arith.constant 4096 : i32
    %401 = vector.broadcast %c4096_i32 : i32 to vector<1x1xi32>
    %402 = arith.ori %400, %401 : vector<1x1xi32>
    %403 = vector.broadcast %402 : vector<1x1xi32> to vector<1x128xi32>
    %404 = arith.cmpi sge, %237, %403 : vector<1x128xi32>
    %405 = arith.extui %404 : vector<1x128xi1> to vector<1x128xi32>
    %cst_79 = arith.constant dense<0> : vector<1xi32>
    %406 = vector.multi_reduction <add>, %405, %cst_79 [1] : vector<1x128xi32> to vector<1xi32>
    %407 = vector.shape_cast %406 : vector<1xi32> to vector<1x1xi32>
    %408 = arith.cmpi sge, %407, %232 : vector<1x1xi32>
    %409 = arith.select %408, %402, %400 : vector<1x1xi1>, vector<1x1xi32>
    %c2048_i32 = arith.constant 2048 : i32
    %410 = vector.broadcast %c2048_i32 : i32 to vector<1x1xi32>
    %411 = arith.ori %409, %410 : vector<1x1xi32>
    %412 = vector.broadcast %411 : vector<1x1xi32> to vector<1x128xi32>
    %413 = arith.cmpi sge, %237, %412 : vector<1x128xi32>
    %414 = arith.extui %413 : vector<1x128xi1> to vector<1x128xi32>
    %cst_80 = arith.constant dense<0> : vector<1xi32>
    %415 = vector.multi_reduction <add>, %414, %cst_80 [1] : vector<1x128xi32> to vector<1xi32>
    %416 = vector.shape_cast %415 : vector<1xi32> to vector<1x1xi32>
    %417 = arith.cmpi sge, %416, %232 : vector<1x1xi32>
    %418 = arith.select %417, %411, %409 : vector<1x1xi1>, vector<1x1xi32>
    %c1024_i32 = arith.constant 1024 : i32
    %419 = vector.broadcast %c1024_i32 : i32 to vector<1x1xi32>
    %420 = arith.ori %418, %419 : vector<1x1xi32>
    %421 = vector.broadcast %420 : vector<1x1xi32> to vector<1x128xi32>
    %422 = arith.cmpi sge, %237, %421 : vector<1x128xi32>
    %423 = arith.extui %422 : vector<1x128xi1> to vector<1x128xi32>
    %cst_81 = arith.constant dense<0> : vector<1xi32>
    %424 = vector.multi_reduction <add>, %423, %cst_81 [1] : vector<1x128xi32> to vector<1xi32>
    %425 = vector.shape_cast %424 : vector<1xi32> to vector<1x1xi32>
    %426 = arith.cmpi sge, %425, %232 : vector<1x1xi32>
    %427 = arith.select %426, %420, %418 : vector<1x1xi1>, vector<1x1xi32>
    %c512_i32 = arith.constant 512 : i32
    %428 = vector.broadcast %c512_i32 : i32 to vector<1x1xi32>
    %429 = arith.ori %427, %428 : vector<1x1xi32>
    %430 = vector.broadcast %429 : vector<1x1xi32> to vector<1x128xi32>
    %431 = arith.cmpi sge, %237, %430 : vector<1x128xi32>
    %432 = arith.extui %431 : vector<1x128xi1> to vector<1x128xi32>
    %cst_82 = arith.constant dense<0> : vector<1xi32>
    %433 = vector.multi_reduction <add>, %432, %cst_82 [1] : vector<1x128xi32> to vector<1xi32>
    %434 = vector.shape_cast %433 : vector<1xi32> to vector<1x1xi32>
    %435 = arith.cmpi sge, %434, %232 : vector<1x1xi32>
    %436 = arith.select %435, %429, %427 : vector<1x1xi1>, vector<1x1xi32>
    %c256_i32 = arith.constant 256 : i32
    %437 = vector.broadcast %c256_i32 : i32 to vector<1x1xi32>
    %438 = arith.ori %436, %437 : vector<1x1xi32>
    %439 = vector.broadcast %438 : vector<1x1xi32> to vector<1x128xi32>
    %440 = arith.cmpi sge, %237, %439 : vector<1x128xi32>
    %441 = arith.extui %440 : vector<1x128xi1> to vector<1x128xi32>
    %cst_83 = arith.constant dense<0> : vector<1xi32>
    %442 = vector.multi_reduction <add>, %441, %cst_83 [1] : vector<1x128xi32> to vector<1xi32>
    %443 = vector.shape_cast %442 : vector<1xi32> to vector<1x1xi32>
    %444 = arith.cmpi sge, %443, %232 : vector<1x1xi32>
    %445 = arith.select %444, %438, %436 : vector<1x1xi1>, vector<1x1xi32>
    %c128_i32_84 = arith.constant 128 : i32
    %446 = vector.broadcast %c128_i32_84 : i32 to vector<1x1xi32>
    %447 = arith.ori %445, %446 : vector<1x1xi32>
    %448 = vector.broadcast %447 : vector<1x1xi32> to vector<1x128xi32>
    %449 = arith.cmpi sge, %237, %448 : vector<1x128xi32>
    %450 = arith.extui %449 : vector<1x128xi1> to vector<1x128xi32>
    %cst_85 = arith.constant dense<0> : vector<1xi32>
    %451 = vector.multi_reduction <add>, %450, %cst_85 [1] : vector<1x128xi32> to vector<1xi32>
    %452 = vector.shape_cast %451 : vector<1xi32> to vector<1x1xi32>
    %453 = arith.cmpi sge, %452, %232 : vector<1x1xi32>
    %454 = arith.select %453, %447, %445 : vector<1x1xi1>, vector<1x1xi32>
    %c64_i32 = arith.constant 64 : i32
    %455 = vector.broadcast %c64_i32 : i32 to vector<1x1xi32>
    %456 = arith.ori %454, %455 : vector<1x1xi32>
    %457 = vector.broadcast %456 : vector<1x1xi32> to vector<1x128xi32>
    %458 = arith.cmpi sge, %237, %457 : vector<1x128xi32>
    %459 = arith.extui %458 : vector<1x128xi1> to vector<1x128xi32>
    %cst_86 = arith.constant dense<0> : vector<1xi32>
    %460 = vector.multi_reduction <add>, %459, %cst_86 [1] : vector<1x128xi32> to vector<1xi32>
    %461 = vector.shape_cast %460 : vector<1xi32> to vector<1x1xi32>
    %462 = arith.cmpi sge, %461, %232 : vector<1x1xi32>
    %463 = arith.select %462, %456, %454 : vector<1x1xi1>, vector<1x1xi32>
    %c32_i32 = arith.constant 32 : i32
    %464 = vector.broadcast %c32_i32 : i32 to vector<1x1xi32>
    %465 = arith.ori %463, %464 : vector<1x1xi32>
    %466 = vector.broadcast %465 : vector<1x1xi32> to vector<1x128xi32>
    %467 = arith.cmpi sge, %237, %466 : vector<1x128xi32>
    %468 = arith.extui %467 : vector<1x128xi1> to vector<1x128xi32>
    %cst_87 = arith.constant dense<0> : vector<1xi32>
    %469 = vector.multi_reduction <add>, %468, %cst_87 [1] : vector<1x128xi32> to vector<1xi32>
    %470 = vector.shape_cast %469 : vector<1xi32> to vector<1x1xi32>
    %471 = arith.cmpi sge, %470, %232 : vector<1x1xi32>
    %472 = arith.select %471, %465, %463 : vector<1x1xi1>, vector<1x1xi32>
    %c16_i32 = arith.constant 16 : i32
    %473 = vector.broadcast %c16_i32 : i32 to vector<1x1xi32>
    %474 = arith.ori %472, %473 : vector<1x1xi32>
    %475 = vector.broadcast %474 : vector<1x1xi32> to vector<1x128xi32>
    %476 = arith.cmpi sge, %237, %475 : vector<1x128xi32>
    %477 = arith.extui %476 : vector<1x128xi1> to vector<1x128xi32>
    %cst_88 = arith.constant dense<0> : vector<1xi32>
    %478 = vector.multi_reduction <add>, %477, %cst_88 [1] : vector<1x128xi32> to vector<1xi32>
    %479 = vector.shape_cast %478 : vector<1xi32> to vector<1x1xi32>
    %480 = arith.cmpi sge, %479, %232 : vector<1x1xi32>
    %481 = arith.select %480, %474, %472 : vector<1x1xi1>, vector<1x1xi32>
    %c8_i32 = arith.constant 8 : i32
    %482 = vector.broadcast %c8_i32 : i32 to vector<1x1xi32>
    %483 = arith.ori %481, %482 : vector<1x1xi32>
    %484 = vector.broadcast %483 : vector<1x1xi32> to vector<1x128xi32>
    %485 = arith.cmpi sge, %237, %484 : vector<1x128xi32>
    %486 = arith.extui %485 : vector<1x128xi1> to vector<1x128xi32>
    %cst_89 = arith.constant dense<0> : vector<1xi32>
    %487 = vector.multi_reduction <add>, %486, %cst_89 [1] : vector<1x128xi32> to vector<1xi32>
    %488 = vector.shape_cast %487 : vector<1xi32> to vector<1x1xi32>
    %489 = arith.cmpi sge, %488, %232 : vector<1x1xi32>
    %490 = arith.select %489, %483, %481 : vector<1x1xi1>, vector<1x1xi32>
    %c4_i32_90 = arith.constant 4 : i32
    %491 = vector.broadcast %c4_i32_90 : i32 to vector<1x1xi32>
    %492 = arith.ori %490, %491 : vector<1x1xi32>
    %493 = vector.broadcast %492 : vector<1x1xi32> to vector<1x128xi32>
    %494 = arith.cmpi sge, %237, %493 : vector<1x128xi32>
    %495 = arith.extui %494 : vector<1x128xi1> to vector<1x128xi32>
    %cst_91 = arith.constant dense<0> : vector<1xi32>
    %496 = vector.multi_reduction <add>, %495, %cst_91 [1] : vector<1x128xi32> to vector<1xi32>
    %497 = vector.shape_cast %496 : vector<1xi32> to vector<1x1xi32>
    %498 = arith.cmpi sge, %497, %232 : vector<1x1xi32>
    %499 = arith.select %498, %492, %490 : vector<1x1xi1>, vector<1x1xi32>
    %c2_i32 = arith.constant 2 : i32
    %500 = vector.broadcast %c2_i32 : i32 to vector<1x1xi32>
    %501 = arith.ori %499, %500 : vector<1x1xi32>
    %502 = vector.broadcast %501 : vector<1x1xi32> to vector<1x128xi32>
    %503 = arith.cmpi sge, %237, %502 : vector<1x128xi32>
    %504 = arith.extui %503 : vector<1x128xi1> to vector<1x128xi32>
    %cst_92 = arith.constant dense<0> : vector<1xi32>
    %505 = vector.multi_reduction <add>, %504, %cst_92 [1] : vector<1x128xi32> to vector<1xi32>
    %506 = vector.shape_cast %505 : vector<1xi32> to vector<1x1xi32>
    %507 = arith.cmpi sge, %506, %232 : vector<1x1xi32>
    %508 = arith.select %507, %501, %499 : vector<1x1xi1>, vector<1x1xi32>
    %c1_i32 = arith.constant 1 : i32
    %509 = vector.broadcast %c1_i32 : i32 to vector<1x1xi32>
    %510 = arith.ori %508, %509 : vector<1x1xi32>
    %511 = vector.broadcast %510 : vector<1x1xi32> to vector<1x128xi32>
    %512 = arith.cmpi sge, %237, %511 : vector<1x128xi32>
    %513 = arith.extui %512 : vector<1x128xi1> to vector<1x128xi32>
    %cst_93 = arith.constant dense<0> : vector<1xi32>
    %514 = vector.multi_reduction <add>, %513, %cst_93 [1] : vector<1x128xi32> to vector<1xi32>
    %515 = vector.shape_cast %514 : vector<1xi32> to vector<1x1xi32>
    %516 = arith.cmpi sge, %515, %232 : vector<1x1xi32>
    %517 = arith.select %516, %510, %508 : vector<1x1xi1>, vector<1x1xi32>
    %518 = vector.broadcast %517 : vector<1x1xi32> to vector<1x128xi32>
    %519 = arith.cmpi sgt, %237, %518 : vector<1x128xi32>
    %520 = arith.extui %519 : vector<1x128xi1> to vector<1x128xi32>
    %cst_94 = arith.constant dense<0> : vector<1xi32>
    %521 = vector.multi_reduction <add>, %520, %cst_94 [1] : vector<1x128xi32> to vector<1xi32>
    %522 = vector.shape_cast %521 : vector<1xi32> to vector<1x1xi32>
    %cst_95 = arith.constant 0.000000e+00 : f32
    %523 = vector.broadcast %cst_95 : f32 to vector<1x128xf32>
    %524 = arith.select %519, %236, %523 : vector<1x128xi1>, vector<1x128xf32>
    %cst_96 = arith.constant dense<0.000000e+00> : vector<1xf32>
    %525 = vector.multi_reduction <add>, %524, %cst_96 [1] : vector<1x128xf32> to vector<1xf32>
    %526 = vector.shape_cast %525 : vector<1xf32> to vector<1x1xf32>
    %527 = vector.broadcast %517 : vector<1x1xi32> to vector<1x128xi32>
    %528 = arith.cmpi eq, %237, %527 : vector<1x128xi32>
    %cst_97 = arith.constant 0.000000e+00 : f32
    %529 = vector.broadcast %cst_97 : f32 to vector<1x128xf32>
    %530 = arith.select %528, %236, %529 : vector<1x128xi1>, vector<1x128xf32>
    %cst_98 = arith.constant dense<0xFF800000> : vector<1xf32>
    %531 = vector.multi_reduction <maximumf>, %530, %cst_98 [1] : vector<1x128xf32> to vector<1xf32>
    %532 = vector.shape_cast %531 : vector<1xf32> to vector<1x1xf32>
    %533 = arith.subi %232, %522 : vector<1x1xi32>
    %534 = arith.sitofp %533 : vector<1x1xi32> to vector<1x1xf32>
    %cst_99 = arith.constant 0.000000e+00 : f32
    %535 = vector.broadcast %cst_99 : f32 to vector<1x128xf32>
    %536 = arith.select %225, %222, %535 : vector<1x128xi1>, vector<1x128xf32>
    %cst_100 = arith.constant dense<0.000000e+00> : vector<1xf32>
    %537 = vector.multi_reduction <add>, %536, %cst_100 [1] : vector<1x128xf32> to vector<1xf32>
    %538 = vector.shape_cast %537 : vector<1xf32> to vector<1x1xf32>
    %539 = arith.addf %538, %526 : vector<1x1xf32>
    %540 = arith.mulf %534, %532 : vector<1x1xf32>
    %541 = arith.addf %539, %540 : vector<1x1xf32>
    %542 = vector.shape_cast %541 : vector<1x1xf32> to vector<1x1x1xf32>
    %cst_101 = arith.constant dense<0.000000e+00> : vector<1xf32>
    %543 = vector.multi_reduction <add>, %542, %cst_101 [1, 2] : vector<1x1x1xf32> to vector<1xf32>
    %544 = vector.shape_cast %543 : vector<1xf32> to vector<1x1x1xf32>
    %545 = vector.extract %544[0, 0, 0] : f32 from vector<1x1x1xf32>
    %546 = vector.shape_cast %228 : vector<1x1xi32> to vector<1x1x1xi32>
    %cst_102 = arith.constant dense<0> : vector<1xi32>
    %547 = vector.multi_reduction <add>, %546, %cst_102 [1, 2] : vector<1x1x1xi32> to vector<1xi32>
    %548 = vector.shape_cast %547 : vector<1xi32> to vector<1x1x1xi32>
    %549 = vector.extract %548[0, 0, 0] : i32 from vector<1x1x1xi32>
    %550 = arith.sitofp %549 : i32 to f32
    %551 = tpu.iota {dimensions = array<i32: 1>} : vector<1x8x128xi32>
    %c0_i32_103 = arith.constant 0 : i32
    %552 = vector.broadcast %c0_i32_103 : i32 to vector<1x8x128xi32>
    %553 = arith.cmpi eq, %551, %552 : vector<1x8x128xi32>
    %c1_i32_104 = arith.constant 1 : i32
    %554 = vector.broadcast %c1_i32_104 : i32 to vector<1x8x128xi32>
    %555 = arith.cmpi eq, %551, %554 : vector<1x8x128xi32>
    %c2_i32_105 = arith.constant 2 : i32
    %556 = vector.broadcast %c2_i32_105 : i32 to vector<1x8x128xi32>
    %557 = arith.cmpi eq, %551, %556 : vector<1x8x128xi32>
    %cst_106 = arith.constant 0.000000e+00 : f32
    %558 = vector.broadcast %550 : f32 to vector<1x8x128xf32>
    %559 = vector.broadcast %cst_106 : f32 to vector<1x8x128xf32>
    %560 = arith.select %557, %558, %559 : vector<1x8x128xi1>, vector<1x8x128xf32>
    %561 = vector.broadcast %545 : f32 to vector<1x8x128xf32>
    %562 = arith.select %555, %561, %560 : vector<1x8x128xi1>, vector<1x8x128xf32>
    %563 = vector.broadcast %204 : f32 to vector<1x8x128xf32>
    %564 = arith.select %553, %563, %562 : vector<1x8x128xi1>, vector<1x8x128xf32>
    %c0_107 = arith.constant 0 : index
    %c0_108 = arith.constant 0 : index
    %c0_109 = arith.constant 0 : index
    %565 = vector.load %arg5[%c0_107, %c0_108, %c0_109] : memref<1x8x128xf32, #tpu.memory_space<vmem>>, vector<1x8x128xf32>
    tpu.vector_store %arg5[%c0_107, %c0_108, %c0_109], %564 {strides = array<i32>} : memref<1x8x128xf32, #tpu.memory_space<vmem>>, vector<1x8x128xf32>,
    return
  }
  func.func @transform_0(%arg0: i32) -> (i32, i32, i32) {
    %c0_i32 = arith.constant 0 : i32
    %c0_i32_0 = arith.constant 0 : i32
    %c0_i32_1 = arith.constant 0 : i32
    return %arg0, %c0_i32, %c0_i32_0 : i32, i32, i32
  }
  func.func @transform_1(%arg0: i32) -> (i32, i32) {
    %c0_i32 = arith.constant 0 : i32
    %c0_i32_0 = arith.constant 0 : i32
    %c0_i32_1 = arith.constant 0 : i32
    return %c0_i32, %c0_i32_0 : i32, i32
  }
  func.func @transform_2(%arg0: i32) -> (i32, i32, i32) {
    %c0_i32 = arith.constant 0 : i32
    %c0_i32_0 = arith.constant 0 : i32
    %c0_i32_1 = arith.constant 0 : i32
    return %arg0, %c0_i32, %c0_i32_0 : i32, i32, i32
  }
  func.func @transform_3(%arg0: i32) -> (i32, i32, i32) {
    %c0_i32 = arith.constant 0 : i32
    %c0_i32_0 = arith.constant 0 : i32
    %c0_i32_1 = arith.constant 0 : i32
    return %arg0, %c0_i32, %c0_i32_0 : i32, i32, i32
  }
  func.func @transform_4(%arg0: i32) -> (i32, i32, i32) {
    %c0_i32 = arith.constant 0 : i32
    %c0_i32_0 = arith.constant 0 : i32
    %c0_i32_1 = arith.constant 0 : i32
    return %arg0, %c0_i32, %c0_i32_0 : i32, i32, i32
  }
}

</mosaic_0001>

<bundles_post_ra>
// kernel: tpu_custom_call.1
= control target key start
LH: loop header
LB: loop body
LE: loop exit
PB: predicated region body
PF: predicated region fallthrough
CT: control target
= control target key end

     0   :  { %s2193_s0 = inlined_call_operand.hbm [shape: f32[2,4,5], index: 0, kind: input, shape index: {}]   ;;  %s2194_s1 = inlined_call_operand.hbm [shape: f32[8,128], index: 1, kind: input, shape index: {}]   ;;  %s2195_s2 = inlined_call_operand.hbm [shape: f32[2,4,128], index: 2, kind: input, shape index: {}]   ;;  %s2196_s3 = inlined_call_operand.hbm [shape: f32[2,8,128], index: 3, kind: input, shape index: {}]   ;;  %s2197_s4 = inlined_call_operand.hbm [shape: f32[2,8,128], index: 4, kind: output, shape index: {}]  }
   0x1   :  { %2206 = sst [smem:[#allocation14_spill]] %s2193_s0 }
   0x2   :  { %9 = vsyncpa [#allocation3], 0 }
   0x3   :  { %11 = vsyncpa [#allocation3 + $0x1], 0 }
   0x4   :  { %12 = vsyncpa [#allocation6], 0 }
   0x5   :  { %13 = vsyncpa [#allocation4], 0 }
   0x6   :  { %15 = vsyncpa [#allocation4 + $0x1], 0  ;;  %s1684_s15 = smov 0   ;;  %s1686_s16 = smov 0  }
   0x7   :  { %s1688_s17 = smov 0   ;;  %s1690_s18 = smov 0  }
   0x8 LB: > { %s1705_s19 = sadd.s32 1, %s1645_s18   ;;  %s28_s20 = sadd.s32 1, %s1641_s17  ;;  %s1645_s18 = sphi %s1690_s18, %s2235_s18   ;;  %s1641_s17 = sphi %s1688_s17, %s2234_s17   ;;  %s1637_s16 = sphi %s1686_s16, %s2233_s16   ;;  %s1633_s15 = sphi %s1684_s15, %s2232_s15  }
   0x9   : > { %s25_s21 = ssub.s32 %s1645_s18, %s1705_s19  ;;  %p2198_p0 = scmp.ne.s32.totalorder %s1641_s17, %s1637_s16 }
   0xa   : > { %p26_p1 = scmp.eq.s32.totalorder %s25_s21, 0  ;;  %p36_p2 = scmp.eq.s32.totalorder %s1645_s18, 0 }
   0xb   : > { %p1390_p4 = scmp.lt.s32.totalorder %s1645_s18, 2  ;;  %s175_s23 = sand.u32 1, %s1645_s18  }
   0xc   : > { %s1716_s22 = scalar_select %p26_p1, %s1641_s17, %s28_s20  }
   0xd   : > { %p37_p5 = por %p36_p2, %p2198_p0  ;;  %s177_s24 = sand.u32 1, %s1641_s17  }
   0xe   : > { %s1725_s25 = sshll.u32 %s177_s24, 2  ;;  %s1332_s26 = sshll.u32 %s1645_s18, 6 }
   0xf   : > { %s2207_s0 = sld [smem:[#allocation14_spill]]  ;;  %s179_s30 = scalar_lea.vmem [#allocation2], %s1725_s25 }
  0x10   : > { %s186_s5 = sshll.u32 %s179_s30, 4  ;;  %p1734_p6 = pnand %p1390_p4, %p37_p5  ;;  %s1738_s5 = int_to_ptr.vmem [resolvable:$true] %s186_s5 }
  0x11   : > { %s1743_s9 = scalar_lea.hbm %s2195_s2, %s1332_s26  ;;  %s1745_s10 = scalar_lea.sflag [#allocation3], %s175_s23 }
  0x12   : > { %s2208_s6 = scalar_select %p1734_p6, 1, 0 }
  0x13   : > { %p1751_p8 = pneg %p1734_p6 }
  0x15   : > { %s1731_s29 = scalar_lea.hbm %s2207_s0, %s1332_s26  ;;  %s1458_s20 = scalar_lea.hbm %s2207_s0, 128 }
  0x16   : > { %s1453_s11 = scalar_lea.hbm %s1731_s29, 64  ;;  %p1459_p11 = scmp.lt.u32.totalorder %s1731_s29, %s2207_s0 }
  0x17   : > { %p1454_p7 = scmp.ne.s32.totalorder %s1731_s29, %s1453_s11  ;;  %p1460_p12 = scmp.lt.u32.totalorder %s1458_s20, %s1453_s11 }
  0x18   : > { %p1462_p1 = scmp.lt.u32.totalorder %s1453_s11, %s1731_s29 }
  0x19   : > { %p1456_p9 = pnand %p1751_p8, %p1454_p7  ;;  %p1461_p13 = por %p1460_p12, %p1459_p11 }
  0x1b   : > { %p1457_p10 = pneg %p1456_p9  ;;  %p1463_p2 = por %p1462_p1, %p1461_p13 }
  0x1d   : > { %p1464_p4 = pnand %p1463_p2, %p1457_p10 }
  0x1f   : > { %1467 = shalt.err (!%p1464_p4)
}
  0x20   : > { %s1468_s23 = scalar_lea.vmem %s1738_s5, 64  ;;  %s1647_s27 = smov [#allocation2]  }
  0x21   : > { %p1469_p5 = scmp.ne.s32.totalorder %s1738_s5, %s1468_s23  ;;  %s1473_s28 = sshll.u32 %s1647_s27, 4  ;;  %s1474_s28 = int_to_ptr.vmem [resolvable:$false] %s1473_s28 }
  0x22   : > { %s1475_s30 = scalar_lea.vmem %s1474_s28, 128  ;;  %p1476_p3 = scmp.lt.s32.totalorder %s1738_s5, %s1474_s28 }
  0x23   : > { %p1471_p7 = pnand %p1469_p5, %p1751_p8  ;;  %p1477_p0 = scmp.lt.s32.totalorder %s1475_s30, %s1468_s23 }
  0x25   : > { %p1472_p9 = pneg %p1471_p7  ;;  %p1478_p11 = por %p1477_p0, %p1476_p3 }
  0x27   : > { %p1479_p12 = pnand %p1478_p11, %p1472_p9 }
  0x29   : > { %1482 = shalt.err (!%p1479_p12)
}
  0x2a   : > { %1378 = dma.hbm_to_vmem [thread:$0]  (!%p1734_p6), %s1731_s29, 64, %s1738_s5, %s1745_s10  }
  0x2b   : > { %s197_s7 = scalar_lea.vmem [#allocation7], %s1725_s25  ;;  %s1483_s11 = scalar_lea.hbm %s1743_s9, 64 }
  0x2c   : > { %s204_s8 = sshll.u32 %s197_s7, 4  ;;  %p1484_p10 = scmp.ne.s32.totalorder %s1743_s9, %s1483_s11  ;;  %s205_s8 = int_to_ptr.vmem [resolvable:$true] %s204_s8 }
  0x2d   : > { %s1488_s20 = scalar_lea.hbm %s2195_s2, 128  ;;  %p1489_p13 = scmp.lt.u32.totalorder %s1743_s9, %s2195_s2 }
  0x2e   : > { %p1486_p0 = pnand %p1484_p10, %p1751_p8  ;;  %p1490_p1 = scmp.lt.u32.totalorder %s1488_s20, %s1483_s11 }
  0x2f   : > { %p1492_p4 = scmp.lt.u32.totalorder %s1483_s11, %s1743_s9 }
  0x30   : > { %p1487_p3 = pneg %p1486_p0  ;;  %p1491_p2 = por %p1490_p1, %p1489_p13 }
  0x32   : > { %p1493_p5 = por %p1492_p4, %p1491_p2 }
  0x34   : > { %p1494_p7 = pnand %p1493_p5, %p1487_p3 }
  0x36   : > { %1497 = shalt.err (!%p1494_p7)
}
  0x37   : > { %s1498_s25 = scalar_lea.vmem %s205_s8, 64  ;;  %s1648_s29 = smov [#allocation7]  }
  0x38   : > { %p1499_p9 = scmp.ne.s32.totalorder %s205_s8, %s1498_s25  ;;  %s1503_s5 = sshll.u32 %s1648_s29, 4  ;;  %s1504_s5 = int_to_ptr.vmem [resolvable:$false] %s1503_s5 }
  0x39   : > { %s1505_s23 = scalar_lea.vmem %s1504_s5, 128  ;;  %p1506_p10 = scmp.lt.s32.totalorder %s205_s8, %s1504_s5 }
  0x3a   : > { %p1501_p11 = pnand %p1499_p9, %p1751_p8  ;;  %p1507_p0 = scmp.lt.s32.totalorder %s1505_s23, %s1498_s25 }
  0x3c   : > { %p1502_p12 = pneg %p1501_p11  ;;  %p1508_p6 = por %p1507_p0, %p1506_p10 }
  0x3e   : > { %p1509_p1 = pnand %p1508_p6, %p1502_p12 }
  0x40   : > { %1512 = shalt.err (!%p1509_p1)
}
  0x41   : > { %p2210_p13 = scmp.ne.s32.totalorder %s2208_s6, 0  ;;  %s1795_s27 = sadd.s32 4294967295, %s1645_s18  }
  0x42   : > { %s1327_s28 = sadd.s32 4294967294, %s1645_s18   ;;  %p41_p6 = scmp.ne.s32.totalorder %s1637_s16, %s1633_s15 }
  0x43   : > { %1381 = dma.hbm_to_vmem [thread:$0]  (!%p2210_p13), %s1743_s9, 64, %s205_s8, %s1745_s10  }
  0x44   : > { %p2201_p3 = scmp.eq.s32.totalorder %s1795_s27, 0  ;;  %p138_p2 = scmp.eq.s32.totalorder %s1795_s27, 1 }
  0x45   : > { %p144_p4 = scmp.eq.s32.totalorder %s1327_s28, 1  ;;  %p1328_p7 = scmp.ge.s32.totalorder %s1645_s18, 1 }
  0x46   : > { %p1804_p5 = por %p2201_p3, %p41_p6  ;;  %p2212_p9 = scmp.ne.s32.totalorder %s1641_s17, %s1637_s16 }
  0x47   : > { %p1816_p12 = por %p144_p4, %p41_p6  ;;  %p151_p10 = scmp.lt.s32.totalorder %s1645_s18, 3 }
  0x48   : > { %s2211_s30 = scalar_select %p1804_p5, 1, 0 }
  0x49   : > { %p1812_p11 = por %p138_p2, %p2212_p9  ;;  %s1335_s8 = sshll.u32 %s177_s24, 3 }
  0x4a   : > { %s2214_s7 = scalar_select %p1816_p12, 1, 0 }
  0x4b   : > { %s2213_s9 = scalar_select %p1812_p11, 1, 0 }
  0x4c   : > { %p1823_p0 = pnand %p1328_p7, %p151_p10  ;;  %s1649_s13 = smov [#allocation5]  }
  0x4d   : > { %s164_s14 = sshll.u32 %s1649_s13, 4  ;;  %s1336_s20 = sshll.u32 %s1645_s18, 7  ;;  %s1827_s14 = int_to_ptr.vmem [resolvable:$true] %s164_s14 }
  0x4e   : > { %s2215_s11 = scalar_select %p1823_p0, 1, 0 }
  0x4f   : > { %p1371_p1 = pneg %p1823_p0  ;;  %s1835_s25 = scalar_lea.hbm %s2196_s3, %s1336_s20 }
  0x50   : > { %s215_s24 = scalar_lea.vmem [#allocation8], %s1335_s8  ;;  %s1513_s23 = scalar_lea.hbm %s1835_s25, 128 }
  0x51   : > { %s222_s29 = sshll.u32 %s215_s24, 4  ;;  %p1839_p6 = pnand %p1371_p1, %p2201_p3  ;;  %s223_s29 = int_to_ptr.vmem [resolvable:$true] %s222_s29 }
  0x52   : > { %p1514_p2 = scmp.ne.s32.totalorder %s1835_s25, %s1513_s23  ;;  %s1518_s20 = scalar_lea.hbm %s2196_s3, 256 }
  0x53   : > { %s2216_s5 = scalar_select %p1839_p6, 1, 0 }
  0x54   : > { %p1516_p4 = pnand %p1514_p2, %p1751_p8  ;;  %p1519_p9 = scmp.lt.u32.totalorder %s1835_s25, %s2196_s3 }
  0x55   : > { %p1520_p10 = scmp.lt.u32.totalorder %s1518_s20, %s1513_s23  ;;  %p1522_p1 = scmp.lt.u32.totalorder %s1513_s23, %s1835_s25 }
  0x56   : > { %p1517_p7 = pneg %p1516_p4 }
  0x57   : > { %p1521_p12 = por %p1520_p10, %p1519_p9 }
  0x59   : > { %p1523_p3 = por %p1522_p1, %p1521_p12 }
  0x5b   : > { %p1524_p11 = pnand %p1523_p3, %p1517_p7 }
  0x5d   : > { %1527 = shalt.err (!%p1524_p11)
}
  0x5e   : > { %s1528_s8 = scalar_lea.vmem %s223_s29, 128  ;;  %s1650_s24 = smov [#allocation8]  }
  0x5f   : > { %p1529_p5 = scmp.ne.s32.totalorder %s223_s29, %s1528_s8  ;;  %s1533_s0 = sshll.u32 %s1650_s24, 4  ;;  %s1534_s0 = int_to_ptr.vmem [resolvable:$false] %s1533_s0 }
  0x60   : > { %s1535_s28 = scalar_lea.vmem %s1534_s0, 256  ;;  %p1536_p0 = scmp.lt.s32.totalorder %s223_s29, %s1534_s0 }
  0x61   : > { %p1531_p2 = pnand %p1529_p5, %p1751_p8  ;;  %p1537_p6 = scmp.lt.s32.totalorder %s1535_s28, %s1528_s8 }
  0x63   : > { %p1532_p4 = pneg %p1531_p2  ;;  %p1538_p13 = por %p1537_p6, %p1536_p0 }
  0x65   : > { %p1539_p9 = pnand %p1538_p13, %p1532_p4 }
  0x67   : > { %1542 = shalt.err (!%p1539_p9)
}
  0x68   : > { %p2217_p10 = scmp.ne.s32.totalorder %s2208_s6, 0  ;;  %s1543_s12 = scalar_lea.hbm %s2194_s1, 128 }
  0x69   : > { %p1544_p8 = scmp.ne.s32.totalorder %s2194_s1, %s1543_s12  ;;  %p2218_p3 = scmp.ne.s32.totalorder %s2216_s5, 0 }
  0x6a   : > { %1384 = dma.hbm_to_vmem [thread:$0]  (!%p2217_p10), %s1835_s25, 128, %s223_s29, %s1745_s10  }
  0x6b   : > { %p1545_p5 = pneg %p2218_p3  ;;  %p1550_p13 = scmp.lt.u32.totalorder %s1543_s12, %s2194_s1 }
  0x6d   : > { %p1546_p11 = pnand %p1545_p5, %p1544_p8 }
  0x6f   : > { %p1547_p12 = pneg %p1546_p11 }
  0x71   : > { %p1552_p0 = pnand %p1550_p13, %p1547_p12 }
  0x73   : > { %1555 = shalt.err (!%p1552_p0)
}
  0x74   : > { %s1556_s6 = scalar_lea.vmem %s1827_s14, 128  ;;  %p1564_p2 = scmp.lt.s32.totalorder %s1827_s14, %s1827_s14 }
  0x75   : > { %p1557_p6 = scmp.ne.s32.totalorder %s1827_s14, %s1556_s6  ;;  %p1565_p4 = scmp.lt.s32.totalorder %s1556_s6, %s1556_s6 }
  0x77   : > { %p1559_p7 = pnand %p1557_p6, %p1545_p5  ;;  %p1566_p9 = por %p1565_p4, %p1564_p2 }
  0x79   : > { %p1560_p1 = pneg %p1559_p7 }
  0x7b   : > { %p1567_p10 = pnand %p1566_p9, %p1560_p1 }
  0x7d   : > { %1570 = shalt.err (!%p1567_p10)
}
  0x7e   : > { %1374 = dma.hbm_to_vmem [thread:$0]  (!%p2218_p3), %s2194_s1, 128, %s1827_s14, [#allocation6]  }
  0x7f   : > { %p2219_p8 = scmp.ne.s32.totalorder %s2215_s11, 0 }
  0x80   : > { %s233_s29 = sand.u32 (!%p2219_p8), 1, %s1795_s27   ;;  %s1886_s8 = sand.u32 (!%p2219_p8), 1, %s1637_s16  }
  0x81   : > { %231 = sbr.rel (%p2219_p8) target bundleno = 6174 (0x181e), region = 36  ;;  %s1338_s24 = sshll.u32 (!%p2219_p8), %s1886_s8, 2 }
  0x82   : > { %s234_s28 = scalar_lea.sflag (!%p2219_p8), [#allocation3], %s233_s29  ;;  %s237_s23 = scalar_lea.vmem (!%p2219_p8), [#allocation2], %s1338_s24 }
  0x83   : > { %p2220_p5 = scmp.ne.s32.totalorder (!%p2219_p8), %s2211_s30, 0 }
  0x88   : > { %1616 = dma.done.wait (%p2220_p5), %s234_s28, 64  }
  0x89   : > { %1618 = vsyncadd (%p2220_p5), %s234_s28, 4294967232  ;;  %p2221_p3 = scmp.eq.s32.totalorder %s1795_s27, 0 }
  0x8b   : > { %1620 = dma.done.wait (%p2221_p3), [#allocation6], 128   ;;  %p2222_p11 = pmov %p2221_p3 }
  0x8c   : > { %s1897_s11 = scalar_lea.vmem [#allocation7], %s1338_s24 }
  0x8d   : > { %1622 = vsyncadd (%p2222_p11), [#allocation6], 4294967168 }
  0x8e   : > { %1624 = dma.done.wait (%p2220_p5), %s234_s28, 192  }
  0x8f   : > { %1626 = vsyncadd (%p2220_p5), %s234_s28, 4294967104  ;;  %v1651_v0 = vmov 2   ;;  %v1652_v1 = vmov 3   ;;  %v1903_v2 = vld [vmem:[%s237_s23] sm:$0xf]  ;;  %s1653_s14 = smov 2   ;;  %v303_v9 = vlaneseq }
  0x90   : > { %1433 = vset.pattern.permute.xlu1 %v1651_v0  ;;  %1435 = vset.pattern.permute.xlu0 %v1652_v1  ;;  %v1654_v3 = vmov 0   ;;  %v1655_v4 = vmov 1   ;;  %s1656_s30 = smov 127   ;;  %v1917_v13 = vld [vmem:[#allocation5] sm:$0xff]  ;;  %vm372_vm0 = vcmask 1043456   ;;  %v1657_v50 = vmov 4  }
  0x91   : > { %350 = vrot.lane.b32.xlu0 %v1903_v2, %s1653_s14  ;;  %310 = vperm.xlu1 %1433, %v1903_v2   ;;  %v1914_v11 = vshrl.u32 %v303_v9, 7  ;;  %v296_v18 = vrot.slane %v1917_v13, 6  ;;  %v304_v44 = vand.u32 127, %v303_v9  ;;  %s1341_s5 = sshll.u32 %s1886_s8, 3  ;;  %s1348_s26 = sshll.u32 %s1795_s27, 7 }
  0x92   : > { %s259_s13 = scalar_lea.vmem [#allocation8], %s1341_s5  ;;  %s293_s6 = scalar_lea.vmem [#allocation9], %s1341_s5 }
  0x93   : > { %v315_v12 = vsub.s32 2, %v1914_v11  ;;  %v324_v15 = vsub.s32 0, %v1914_v11  ;;  %v344_v16 = vsub.s32 1, %v1914_v11  ;;  %v335_v17 = vsub.s32 3, %v1914_v11  ;;  %v1944_v57 = vld [vmem:[%s259_s13] sm:$0xff]  ;;  %s1207_s10 = sshll.u32 %s293_s6, 4  ;;  %s2149_s24 = scalar_lea.hbm %s2197_s4, %s1348_s26  ;;  %s2151_s10 = int_to_ptr.vmem [resolvable:$true] %s1207_s10 }
  0x94   : > { %v298_v23 = vsub.f32 %v1917_v13, %v296_v18  ;;  %v578_v59 = vrot.slane %v1944_v57, 4  ;;  %s1194_s27 = scalar_lea.sflag [#allocation4], %s1886_s8  ;;  %s1571_s28 = scalar_lea.vmem %s2151_s10, 128 }
  0x95   : > { %1434 = vset.pattern.permute.xlu1 %v1654_v3  ;;  %v316_v19 = vrot.slane %v1917_v13, %v315_v12  ;;  %v325_v20 = vrot.slane %v1917_v13, %v324_v15  ;;  %v345_v21 = vrot.slane %v1917_v13, %v344_v16  ;;  %v336_v22 = vrot.slane %v1917_v13, %v335_v17  ;;  %p1572_p12 = scmp.ne.s32.totalorder %s2151_s10, %s1571_s28  ;;  %p2229_p13 = scmp.ne.s32.totalorder %s2213_s9, 0 }
  0x96   : > { %319 = vperm.xlu1 %1434, %v1903_v2   ;;  %v300_v30 = vrot.slane %v298_v23, 1  ;;  %v579_v61 = vmax.f32 %v1944_v57, %v578_v59  ;;  %s1658_s23 = smov [#allocation9]  }
  0x97   : > { %p1573_p0 = pnand %p1572_p12, %p2229_p13 }
  0x98   : > { %v302_v33 = vmul.f32 %v300_v30, %v298_v23  ;;  %v580_v63 = vrot.slane %v579_v61, 2 }
  0x99   : > { %p1574_p6 = pneg %p1573_p0 }
  0x9a   : > { %1436 = vset.pattern.permute.xlu1 %v1655_v4  ;;  %v367_v36 = vrot.slane %v302_v33, %v315_v12  ;;  %v581_v1 = vmax.f32 %v579_v61, %v580_v63 }
  0x9b   : > { %339 = vperm.xlu1 %1436, %v1903_v2  }
  0x9f   : > { %1437 = vset.pattern.permute.xlu1 %v1651_v0 }
 0x103   : > { %v351_v5 = vpop.permute.xlu0 %350 }
 0x104   : > { %v353_v6 = vsub.f32 %v1903_v2, %v351_v5 }
 0x106   : > { %355 = vrot.lane.b32.xlu0 %v353_v6, %s1656_s30 }
 0x10a   : > { %330 = vperm.xlu0 %1435, %v1903_v2  }
 0x10e   : > { %1438 = vset.pattern.permute.xlu0 %v1657_v50 }
 0x110   : > { %v1912_v10 = vpop.permute.xlu1 %310 }
 0x111   : > { %v317_v26 = vmin.f32 %v1912_v10, %v316_v19 }
 0x115   : > { %v1919_v14 = vpop.permute.xlu1 %319 }
 0x116   : > { %v326_v27 = vmax.f32 %v1919_v14, %v325_v20 }
 0x118   : > { %v327_v31 = vsub.f32 %v317_v26, %v326_v27 }
 0x11a   : > { %v1930_v24 = vpop.permute.xlu1 %339  ;;  %v328_v34 = vmax.f32 %v327_v31, 0.0 }
 0x11b   : > { %v346_v28 = vmax.f32 %v1930_v24, %v345_v21 }
 0x178   : > { %v356_v7 = vpop.permute.xlu0 %355 }
 0x179   : > { %v358_v8 = vmul.f32 %v356_v7, %v353_v6 }
 0x17b   : > { %361 = vperm.xlu1 %1437, %v358_v8  }
 0x189   : > { %v1932_v25 = vpop.permute.xlu0 %330 }
 0x18a   : > { %v337_v29 = vmin.f32 %v1932_v25, %v336_v22 }
 0x18c   : > { %v347_v32 = vsub.f32 %v337_v29, %v346_v28 }
 0x18e   : > { %v348_v35 = vmax.f32 %v347_v32, 0.0 }
 0x190   : > { %v349_v38 = vmul.f32 %v348_v35, %v328_v34 }
 0x1fa   : > { %v362_v37 = vpop.permute.xlu1 %361 }
 0x1fb   : > { %v368_v39 = vadd.f32 %v367_v36, %v362_v37 }
 0x1fd   : > { %v369_v40 = vsub.f32 %v368_v39, %v349_v38 }
 0x1ff   : > { %1439 = vrcp.f32 %v369_v40 }
 0x209   : > { %v1440_v41 = vpop.eup %1439 }
 0x20a   : > { %v371_v42 = vmul.f32 %v1440_v41, %v349_v38 }
 0x20c   : > { %v373_v43 = vsel %vm372_vm0, %v371_v42, -inf }
 0x20d   : > { %374 = vmax.xlane.f32.xlu0 %v373_v43  ;;  %v393_v55 = vrot.slane %v373_v43, 4 }
 0x20f   : > { %v394_v56 = vmax.f32 %v373_v43, %v393_v55 }
 0x211   : > { %v395_v58 = vrot.slane %v394_v56, 2 }
 0x213   : > { %v396_v60 = vmax.f32 %v394_v56, %v395_v58 }
 0x215   : > { %v397_v62 = vrot.slane %v396_v60, 1 }
 0x217   : > { %v1948_v0 = vmax.f32 %v396_v60, %v397_v62 }
 0x219   : > { %vm399_vm3 = vcmp.eq.f32.partialorder %v371_v42, %v1948_v0 }
 0x21a   : > { %v400_v4 = vsel %vm399_vm3, %v1914_v11, 4 }
 0x21b   : > { %v401_v6 = vsel %vm372_vm0, %v400_v4, 2147483647 }
 0x21c   : > { %v402_v7 = vrot.slane %v401_v6, 4 }
 0x21e   : > { %vm403_vm4 = vcmp.lt.s32.totalorder %v401_v6, %v402_v7 }
 0x21f   : > { %v404_v15 = vsel %vm403_vm4, %v401_v6, %v402_v7 }
 0x220   : > { %v405_v20 = vrot.slane %v404_v15, 2 }
 0x222   : > { %vm406_vm6 = vcmp.lt.s32.totalorder %v404_v15, %v405_v20 }
 0x223   : > { %v407_v29 = vsel %vm406_vm6, %v404_v15, %v405_v20 }
 0x224   : > { %v408_v35 = vrot.slane %v407_v29, 1 }
 0x226   : > { %vm409_vm11 = vcmp.lt.s32.totalorder %v407_v29, %v408_v35 }
 0x29a   : > { %v375_v45 = vpop.xlane.xlu0 %374 }
 0x29b   : > { %vm376_vm1 = vcmp.eq.f32.partialorder %v371_v42, %v375_v45 }
 0x29c   : > { %v377_v46 = vsel %vm376_vm1, %v304_v44, 128 }
 0x29d   : > { %v378_v47 = vsel %vm372_vm0, %v377_v46, 2147483647 }
 0x29e   : > { %v380_v48 = vshra.s32 %v378_v47, 16  ;;  %v379_v51 = vand.u32 65535, %v378_v47 }
 0x2a0   : > { %v382_v49 = vcvt.s32.f32 %v380_v48  ;;  %v381_v53 = vcvt.s32.f32 %v379_v51  ;;  %v489_v48 = vmul.f32 0.1, %v1917_v13 }
 0x2a2   : > { %383 = vmin.xlane.f32.xlu1 %v382_v49 }
 0x32f   : > { %v384_v52 = vpop.xlane.xlu1 %383 }
 0x330   : > { %vm385_vm2 = vcmp.eq.f32.partialorder %v382_v49, %v384_v52  ;;  %v390_v9 = vcvt.f32.s32 %v384_v52 }
 0x331   : > { %v386_v54 = vsel %vm385_vm2, %v381_v53, inf }
 0x332   : > { %387 = vmin.xlane.f32.xlu0 %v386_v54  ;;  %v391_v17 = vshll.u32 %v390_v9, 16 }
 0x348   : > { %471 = vperm.xlu0 %1438, %v1903_v2   ;;  %v582_v2 = vrot.slane %v581_v1, 1 }
 0x34a   : > { %v1952_v5 = vmax.f32 %v581_v1, %v582_v2 }
 0x34c   : > { %v584_v8 = vsub.f32 %v1944_v57, %v1952_v5 }
 0x34e   : > { %v585_v12 = vmul.f32 1.442695, %v584_v8 }
 0x350   : > { %1441 = vpow2.f32 %v585_v12 }
 0x351   : > { %1443 = vrcp.f32 %v1917_v13 }
 0x35a   : > { %v1442_v30 = vpop.eup %1441 }
 0x35b   : > { %v587_v36 = vrot.slane %v1442_v30, 4 }
 0x35d   : > { %v588_v41 = vadd.f32 %v1442_v30, %v587_v36 }
 0x35f   : > { %v589_v47 = vrot.slane %v588_v41, 2 }
 0x361   : > { %v590_v4 = vadd.f32 %v589_v47, %v588_v41 }
 0x363   : > { %v591_v20 = vrot.slane %v590_v4, 1 }
 0x3bf   : > { %v388_v16 = vpop.xlane.xlu0 %387 }
 0x3c0   : > { %v389_v18 = vcvt.f32.s32 %v388_v16 }
 0x3c2   : > { %v392_v19 = vadd.s32 %v391_v17, %v389_v18 }
 0x3c4   : > { %vm411_vm5 = vcmp.eq.s32.totalorder %v392_v19, %v304_v44  ;;  %v410_v44 = vsel %vm409_vm11, %v407_v29, %v408_v35 }
 0x3c5   : > { %v412_v21 = vsel %vm411_vm5, 1, %v1654_v3  ;;  %v424_v22 = vsel %vm411_vm5, %v1914_v11, 4294967295 }
 0x3c6   : > { %v413_v23 = vsel %vm372_vm0, %v412_v21, 2147483648  ;;  %v425_v26 = vsel %vm372_vm0, %v424_v22, 2147483648 }
 0x3c7   : > { %v414_v27 = vrot.slane %v413_v23, 4  ;;  %v426_v28 = vrot.slane %v425_v26, 4  ;;  %v472_v49 = vpop.permute.xlu0 %471 }
 0x3c9   : > { %vm415_vm7 = vcmp.gt.s32.totalorder %v413_v23, %v414_v27  ;;  %vm427_vm8 = vcmp.gt.s32.totalorder %v425_v26, %v426_v28 }
 0x3ca   : > { %v416_v31 = vsel %vm415_vm7, %v413_v23, %v414_v27  ;;  %v428_v32 = vsel %vm427_vm8, %v425_v26, %v426_v28 }
 0x3cb   : > { %v417_v33 = vrot.slane %v416_v31, 2  ;;  %v429_v34 = vrot.slane %v428_v32, 2 }
 0x3cd   : > { %vm418_vm9 = vcmp.gt.s32.totalorder %v416_v31, %v417_v33  ;;  %vm430_vm10 = vcmp.gt.s32.totalorder %v428_v32, %v429_v34 }
 0x3ce   : > { %v419_v37 = vsel %vm418_vm9, %v416_v31, %v417_v33  ;;  %v431_v38 = vsel %vm430_vm10, %v428_v32, %v429_v34  ;;  %v1444_v32 = vpop.eup %1443  ;;  %v592_v34 = vadd.f32 %v591_v20, %v590_v4 }
 0x3cf   : > { %v420_v39 = vrot.slane %v419_v37, 1  ;;  %v432_v40 = vrot.slane %v431_v38, 1 }
 0x3d1   : > { %vm421_vm12 = vcmp.gt.s32.totalorder %v419_v37, %v420_v39  ;;  %vm433_vm13 = vcmp.gt.s32.totalorder %v431_v38, %v432_v40 }
 0x3d2   : > { %v1961_v42 = vsel %vm421_vm12, %v419_v37, %v420_v39  ;;  %v434_v43 = vsel %vm433_vm13, %v431_v38, %v432_v40 }
 0x3d3   : > { %vm423_vm14 = vcmp.gt.s32.totalorder %v1961_v42, 0 }
 0x3d4   : > { %v435_v45 = vsel %vm423_vm14, %v434_v43, %v410_v44  ;;  %v436_v46 = vsel %vm423_vm14, 2.0, %v1948_v0 }
 0x3d5   : > { %vm1967_vm15 = vcmp.eq.s32.totalorder %v435_v45, %v1914_v11 }
 0x3d6   : > { %v438_v50 = vsel %vm1967_vm15, %v1919_v14, 0.0  ;;  %v446_v51 = vsel %vm1967_vm15, %v1930_v24, 0.0  ;;  %v454_v52 = vsel %vm1967_vm15, %v1912_v10, 0.0  ;;  %v462_v53 = vsel %vm1967_vm15, %v1932_v25, 0.0 }
 0x3d7   : > { %v439_v54 = vsel %vm372_vm0, %v438_v50, 0.0  ;;  %v447_v55 = vsel %vm372_vm0, %v446_v51, 0.0  ;;  %v455_v56 = vsel %vm372_vm0, %v454_v52, 0.0  ;;  %v463_v14 = vsel %vm372_vm0, %v462_v53, 0.0 }
 0x3d8   : > { %v440_v58 = vrot.slane %v439_v54, 4  ;;  %v448_v59 = vrot.slane %v447_v55, 4  ;;  %v456_v60 = vrot.slane %v455_v56, 4  ;;  %v464_v24 = vrot.slane %v463_v14, 4 }
 0x3d9   : > { %v474_v61 = vsel %vm1967_vm15, %v472_v49, 0.0  ;;  %v491_v10 = vrot.slane %v489_v48, 2 }
 0x3da   : > { %v441_v62 = vadd.f32 %v440_v58, %v439_v54  ;;  %v449_v25 = vadd.f32 %v448_v59, %v447_v55  ;;  %v457_v63 = vadd.f32 %v456_v60, %v455_v56  ;;  %v465_v1 = vadd.f32 %v464_v24, %v463_v14  ;;  %v511_v54 = vld [vmem:[%s1897_s11] sm:$0xf]  ;;  %s1575_s11 = sshll.u32 %s1658_s23, 4  ;;  %s1576_s11 = int_to_ptr.vmem [resolvable:$false] %s1575_s11 }
 0x3db   : > { %v475_v2 = vsel %vm372_vm0, %v474_v61, 0.0  ;;  %1445 = vrcp.f32 %v491_v10  ;;  %vm483_vm0 = vcmp.lt.f32.partialorder %v436_v46, 0.5  ;;  %s1577_s14 = scalar_lea.vmem %s1576_s11, 256  ;;  %p1578_p7 = scmp.lt.s32.totalorder %s2151_s10, %s1576_s11 }
 0x3dc   : > { %v442_v6 = vrot.slane %v441_v62, 2  ;;  %v450_v7 = vrot.slane %v449_v25, 2  ;;  %v458_v8 = vrot.slane %v457_v63, 2  ;;  %v466_v9 = vrot.slane %v465_v1, 2  ;;  %p1579_p1 = scmp.lt.s32.totalorder %s1577_s14, %s1571_s28 }
 0x3dd   : > { %v476_v12 = vrot.slane %v475_v2, 4  ;;  %1447 = vlog2.f32 %v592_v34 }
 0x3de   : > { %v443_v15 = vadd.f32 %v442_v6, %v441_v62  ;;  %v451_v16 = vadd.f32 %v450_v7, %v449_v25  ;;  %v459_v17 = vadd.f32 %v458_v8, %v457_v63  ;;  %v467_v18 = vadd.f32 %v466_v9, %v465_v1  ;;  %p1580_p2 = por %p1579_p1, %p1578_p7 }
 0x3df   : > { %v477_v19 = vadd.f32 %v476_v12, %v475_v2 }
 0x3e0   : > { %v444_v21 = vrot.slane %v443_v15, 1  ;;  %v452_v22 = vrot.slane %v451_v16, 1  ;;  %v460_v23 = vrot.slane %v459_v17, 1  ;;  %v468_v26 = vrot.slane %v467_v18, 1  ;;  %p1581_p4 = pnand %p1580_p2, %p1574_p6 }
 0x3e1   : > { %v478_v27 = vrot.slane %v477_v19, 2 }
 0x3e2   : > { %v445_v28 = vadd.f32 %v444_v21, %v443_v15  ;;  %v453_v29 = vadd.f32 %v452_v22, %v451_v16  ;;  %v461_v30 = vadd.f32 %v460_v23, %v459_v17  ;;  %v469_v31 = vadd.f32 %v468_v26, %v467_v18 }
 0x3e3   : > { %v479_v33 = vadd.f32 %v478_v27, %v477_v19 }
 0x3e4   : > { %v486_v35 = vadd.f32 %v461_v30, %v445_v28  ;;  %v495_v36 = vadd.f32 %v469_v31, %v453_v29  ;;  %v499_v37 = vsub.f32 %v461_v30, %v445_v28  ;;  %v506_v38 = vsub.f32 %v469_v31, %v453_v29 }
 0x3e5   : > { %v480_v39 = vrot.slane %v479_v33, 1  ;;  %v1446_v45 = vpop.eup %1445 }
 0x3e6   : > { %v487_v40 = vmul.f32 0.5, %v486_v35  ;;  %v496_v41 = vmul.f32 0.5, %v495_v36  ;;  %v501_v43 = vmul.f32 %v1444_v32, %v499_v37  ;;  %v507_v44 = vmul.f32 %v1444_v32, %v506_v38 }
 0x3e7   : > { %v481_v47 = vadd.f32 %v480_v39, %v479_v33 }
 0x3e8   : > { %v488_v48 = vsub.f32 %v487_v40, %v1917_v13  ;;  %v497_v49 = vsub.f32 %v496_v41, %v1917_v13  ;;  %1449 = vlog2.f32 %v501_v43  ;;  %v1448_v13 = vpop.eup %1447 }
 0x3e9   : > { %v482_v50 = vadd.f32 1.0, %v481_v47  ;;  %1451 = vlog2.f32 %v507_v44  ;;  %v594_v17 = vmul.f32 0.6931472, %v1448_v13 }
 0x3ea   : > { %v494_v51 = vmul.f32 %v1446_v45, %v488_v48  ;;  %v498_v52 = vmul.f32 %v1446_v45, %v497_v49 }
 0x3eb   : > { %v484_v53 = vsel %vm483_vm0, 0.0, %v482_v50  ;;  %v595_v30 = vadd.f32 %v594_v17, %v1952_v5 }
 0x3ec   : > { %v1351_v55 = vtrunc.f32 %v484_v53  ;;  %v513_v56 = vrot.slane %v494_v51, 4  ;;  %v523_v14 = vrot.slane %v498_v52, 4 }
 0x3ee   : > { %v1998_v58 = vcvt.f32.s32 %v1351_v55  ;;  %v525_v0 = vsub.f32 %v511_v54, %v523_v14  ;;  %v515_v42 = vsub.f32 %v511_v54, %v513_v56 }
 0x3f0   : > { %vm564_vm1 = vcmp.gt.s32.totalorder %v1998_v58, 0  ;;  %vm596_vm2 = vcmp.eq.s32.totalorder %v1914_v11, %v1998_v58  ;;  %v526_v24 = vand.u32 2147483647, %v525_v0  ;;  %v528_v61 = vmul.f32 0.5, %v525_v0 }
 0x3f1   : > { %v597_v59 = vsel %vm596_vm2, %v1944_v57, 0.0  ;;  %v605_v60 = vsel %vm564_vm1, 1, %v1654_v3  ;;  %v516_v2 = vand.u32 2147483647, %v515_v42  ;;  %v518_v4 = vmul.f32 0.5, %v515_v42 }
 0x3f2   : > { %v1450_v10 = vpop.eup %1449  ;;  %v598_v62 = vrot.slane %v597_v59, 4  ;;  %v607_v25 = vshrl.u32 %v605_v60, 16  ;;  %v606_v8 = vand.u32 65535, %v605_v60  ;;  %vm2007_vm3 = vcmp.lt.f32.partialorder %v526_v24, 1.0 }
 0x3f3   : > { %v1452_v63 = vpop.eup %1451  ;;  %v503_v1 = vmul.f32 0.6931472, %v1450_v10  ;;  %v529_v15 = vmul.f32 %v528_v61, %v525_v0  ;;  %v1344_v16 = vadd.f32 -0.5, %v526_v24  ;;  %v519_v27 = vmul.f32 %v518_v4, %v515_v42 }
 0x3f4   : > { %v599_v6 = vadd.f32 %v598_v62, %v597_v59  ;;  %v609_v7 = vcvt.s32.f32 %v607_v25  ;;  %v509_v9 = vmul.f32 0.6931472, %v1452_v63  ;;  %v608_v22 = vcvt.s32.f32 %v606_v8 }
 0x3f5   : > { %v505_v12 = vmul.f32 5.0, %v503_v1  ;;  %v531_v23 = vsel %vm2007_vm3, %v529_v15, %v1344_v16  ;;  %v1343_v28 = vadd.f32 -0.5, %v516_v2  ;;  %vm2014_vm4 = vcmp.lt.f32.partialorder %v516_v2, 1.0 }
 0x3f6   : > { %v600_v18 = vrot.slane %v599_v6, 2  ;;  %612 = vadd.xlane.f32.xlu1 %v609_v7  ;;  %v510_v19 = vmul.f32 5.0, %v509_v9  ;;  %v533_v34 = vrot.slane %v531_v23, 1 }
 0x3f7   : > { %v537_v20 = vrot.slane %v505_v12, 4  ;;  %v521_v40 = vsel %vm2014_vm4, %v519_v27, %v1343_v28 }
 0x3f8   : > { %v601_v21 = vadd.f32 %v600_v18, %v599_v6  ;;  %v551_v26 = vrot.slane %v510_v19, 4  ;;  %v535_v46 = vadd.f32 %v533_v34, %v521_v40 }
 0x3f9   : > { %v539_v29 = vsub.f32 %v511_v54, %v537_v20 }
 0x3fa   : > { %v602_v31 = vrot.slane %v601_v21, 1  ;;  %610 = vadd.xlane.f32.xlu1 %v608_v22  ;;  %v553_v33 = vsub.f32 %v511_v54, %v551_v26 }
 0x3fb   : > { %v540_v35 = vand.u32 2147483647, %v539_v29  ;;  %v542_v36 = vmul.f32 0.5, %v539_v29 }
 0x3fc   : > { %v603_v37 = vadd.f32 %v602_v31, %v601_v21  ;;  %v554_v38 = vand.u32 2147483647, %v553_v33  ;;  %v556_v39 = vmul.f32 0.5, %v553_v33 }
 0x3fd   : > { %vm541_vm5 = vcmp.lt.f32.partialorder %v540_v35, 1.0  ;;  %v543_v41 = vmul.f32 %v542_v36, %v539_v29  ;;  %v1345_v43 = vadd.f32 -0.5, %v540_v35 }
 0x3fe   : > { %v604_v5 = vsub.f32 %v595_v30, %v603_v37  ;;  %vm555_vm6 = vcmp.lt.f32.partialorder %v554_v38, 1.0  ;;  %v557_v44 = vmul.f32 %v556_v39, %v553_v33  ;;  %v1346_v45 = vadd.f32 -0.5, %v554_v38 }
 0x3ff   : > { %v545_v47 = vsel %vm541_vm5, %v543_v41, %v1345_v43 }
 0x400   : > { %v621_v48 = vsel %vm564_vm1, 0.0, %v604_v5  ;;  %v547_v49 = vrot.slane %v545_v47, 2  ;;  %v559_v50 = vsel %vm555_vm6, %v557_v44, %v1346_v45  ;;  %v2024_v51 = vsel %vm564_vm1, %v604_v5, 0.0 }
 0x401   : > { %v2026_v52 = vmax.f32 %v621_v48, 0.0  ;;  %v561_v54 = vrot.slane %v559_v50, 3 }
 0x402   : > { %v549_v53 = vadd.f32 %v547_v49, %v535_v46 }
 0x403   : > { %vm624_vm7 = vcmp.ge.s32.totalorder %v2026_v52, 1073741824 }
 0x404   : > { %v625_v55 = vsel %vm624_vm7, 1, %v1654_v3  ;;  %v563_v56 = vadd.f32 %v561_v54, %v549_v53 }
 0x405   : > { %v627_v14 = vshrl.u32 %v625_v55, 16  ;;  %v626_v13 = vand.u32 65535, %v625_v55 }
 0x406   : > { %v2032_v0 = vsel %vm564_vm1, %v563_v56, 0.0 }
 0x407   : > { %v629_v42 = vcvt.s32.f32 %v627_v14  ;;  %v628_v59 = vcvt.s32.f32 %v626_v13 }
 0x409   : > { %632 = vadd.xlane.f32.xlu1 %v629_v42 }
 0x40d   : > { %630 = vadd.xlane.f32.xlu1 %v628_v59 }
 0x483   : > { %v613_v60 = vpop.xlane.xlu1 %612 }
 0x484   : > { %v615_v61 = vcvt.f32.s32 %v613_v60 }
 0x486   : > { %v616_v62 = vshll.u32 %v615_v61, 16 }
 0x487   : > { %v611_v24 = vpop.xlane.xlu1 %610 }
 0x488   : > { %v614_v10 = vcvt.f32.s32 %v611_v24 }
 0x48a   : > { %v2034_v25 = vadd.s32 %v616_v62, %v614_v10 }
 0x48c   : > { %v618_v1 = vmul.u32 3, %v2034_v25 }
 0x48e   : > { %vm619_vm8 = vcmp.lt.s32.totalorder %v618_v1, 127 }
 0x48f   : > { %v2037_v8 = vsel %vm619_vm8, %v618_v1, 127 }
 0x496   : > { %v633_v63 = vpop.xlane.xlu1 %632 }
 0x497   : > { %v635_v2 = vcvt.f32.s32 %v633_v63 }
 0x499   : > { %v636_v58 = vshll.u32 %v635_v2, 16 }
 0x49a   : > { %v631_v4 = vpop.xlane.xlu1 %630 }
 0x49b   : > { %v634_v6 = vcvt.f32.s32 %v631_v4 }
 0x49d   : > { %v637_v7 = vadd.s32 %v636_v58, %v634_v6 }
 0x49f   : > { %vm638_vm9 = vcmp.ge.s32.totalorder %v637_v7, %v2037_v8 }
 0x4a0   : > { %v639_v9 = vsel %vm638_vm9, 1073741824, %v1654_v3 }
 0x4a1   : > { %v640_v12 = vor.u32 536870912, %v639_v9 }
 0x4a3   : > { %vm641_vm10 = vcmp.ge.s32.totalorder %v2026_v52, %v640_v12 }
 0x4a4   : > { %v642_v57 = vsel %vm641_vm10, 1, %v1654_v3 }
 0x4a5   : > { %v644_v15 = vshrl.u32 %v642_v57, 16  ;;  %v643_v17 = vand.u32 65535, %v642_v57 }
 0x4a7   : > { %v646_v16 = vcvt.s32.f32 %v644_v15  ;;  %v645_v18 = vcvt.s32.f32 %v643_v17 }
 0x4a9   : > { %649 = vadd.xlane.f32.xlu1 %v646_v16 }
 0x4ad   : > { %647 = vadd.xlane.f32.xlu1 %v645_v18 }
 0x536   : > { %v650_v19 = vpop.xlane.xlu1 %649 }
 0x537   : > { %v652_v20 = vcvt.f32.s32 %v650_v19 }
 0x539   : > { %v653_v22 = vshll.u32 %v652_v20, 16 }
 0x53a   : > { %v648_v21 = vpop.xlane.xlu1 %647 }
 0x53b   : > { %v651_v23 = vcvt.f32.s32 %v648_v21 }
 0x53d   : > { %v654_v26 = vadd.s32 %v653_v22, %v651_v23 }
 0x53f   : > { %vm655_vm11 = vcmp.ge.s32.totalorder %v654_v26, %v2037_v8 }
 0x540   : > { %v656_v27 = vsel %vm655_vm11, %v640_v12, %v639_v9 }
 0x541   : > { %v657_v28 = vor.u32 268435456, %v656_v27 }
 0x543   : > { %vm658_vm12 = vcmp.ge.s32.totalorder %v2026_v52, %v657_v28 }
 0x544   : > { %v659_v29 = vsel %vm658_vm12, 1, %v1654_v3 }
 0x545   : > { %v661_v30 = vshrl.u32 %v659_v29, 16  ;;  %v660_v32 = vand.u32 65535, %v659_v29 }
 0x547   : > { %v663_v31 = vcvt.s32.f32 %v661_v30  ;;  %v662_v33 = vcvt.s32.f32 %v660_v32 }
 0x549   : > { %666 = vadd.xlane.f32.xlu1 %v663_v31 }
 0x54d   : > { %664 = vadd.xlane.f32.xlu1 %v662_v33 }
 0x5d6   : > { %v667_v34 = vpop.xlane.xlu1 %666 }
 0x5d7   : > { %v669_v35 = vcvt.f32.s32 %v667_v34 }
 0x5d9   : > { %v670_v37 = vshll.u32 %v669_v35, 16 }
 0x5da   : > { %v665_v36 = vpop.xlane.xlu1 %664 }
 0x5db   : > { %v668_v38 = vcvt.f32.s32 %v665_v36 }
 0x5dd   : > { %v671_v39 = vadd.s32 %v670_v37, %v668_v38 }
 0x5df   : > { %vm672_vm13 = vcmp.ge.s32.totalorder %v671_v39, %v2037_v8 }
 0x5e0   : > { %v673_v40 = vsel %vm672_vm13, %v657_v28, %v656_v27 }
 0x5e1   : > { %v674_v41 = vor.u32 134217728, %v673_v40 }
 0x5e3   : > { %vm675_vm14 = vcmp.ge.s32.totalorder %v2026_v52, %v674_v41 }
 0x5e4   : > { %v676_v43 = vsel %vm675_vm14, 1, %v1654_v3 }
 0x5e5   : > { %v678_v5 = vshrl.u32 %v676_v43, 16  ;;  %v677_v45 = vand.u32 65535, %v676_v43 }
 0x5e7   : > { %v680_v44 = vcvt.s32.f32 %v678_v5  ;;  %v679_v46 = vcvt.s32.f32 %v677_v45 }
 0x5e9   : > { %683 = vadd.xlane.f32.xlu1 %v680_v44 }
 0x5ed   : > { %681 = vadd.xlane.f32.xlu1 %v679_v46 }
 0x676   : > { %v684_v47 = vpop.xlane.xlu1 %683 }
 0x677   : > { %v686_v48 = vcvt.f32.s32 %v684_v47 }
 0x679   : > { %v687_v50 = vshll.u32 %v686_v48, 16 }
 0x67a   : > { %v682_v49 = vpop.xlane.xlu1 %681 }
 0x67b   : > { %v685_v53 = vcvt.f32.s32 %v682_v49 }
 0x67d   : > { %v688_v54 = vadd.s32 %v687_v50, %v685_v53 }
 0x67f   : > { %vm689_vm15 = vcmp.ge.s32.totalorder %v688_v54, %v2037_v8 }
 0x680   : > { %v690_v55 = vsel %vm689_vm15, %v674_v41, %v673_v40 }
 0x681   : > { %v691_v56 = vor.u32 67108864, %v690_v55 }
 0x683   : > { %vm692_vm0 = vcmp.ge.s32.totalorder %v2026_v52, %v691_v56 }
 0x684   : > { %v693_v14 = vsel %vm692_vm0, 1, %v1654_v3 }
 0x685   : > { %v695_v42 = vshrl.u32 %v693_v14, 16  ;;  %v694_v13 = vand.u32 65535, %v693_v14 }
 0x687   : > { %v697_v59 = vcvt.s32.f32 %v695_v42  ;;  %v696_v60 = vcvt.s32.f32 %v694_v13 }
 0x689   : > { %700 = vadd.xlane.f32.xlu1 %v697_v59  ;;  %698 = vadd.xlane.f32.xlu0 %v696_v60 }
 0x716   : > { %v701_v24 = vpop.xlane.xlu1 %700  ;;  %v699_v61 = vpop.xlane.xlu0 %698 }
 0x717   : > { %v703_v10 = vcvt.f32.s32 %v701_v24  ;;  %v702_v63 = vcvt.f32.s32 %v699_v61 }
 0x719   : > { %v704_v62 = vshll.u32 %v703_v10, 16 }
 0x71b   : > { %v705_v1 = vadd.s32 %v704_v62, %v702_v63 }
 0x71d   : > { %vm706_vm1 = vcmp.ge.s32.totalorder %v705_v1, %v2037_v8 }
 0x71e   : > { %v707_v2 = vsel %vm706_vm1, %v691_v56, %v690_v55 }
 0x71f   : > { %v708_v4 = vor.u32 33554432, %v707_v2 }
 0x721   : > { %vm709_vm2 = vcmp.ge.s32.totalorder %v2026_v52, %v708_v4 }
 0x722   : > { %v710_v58 = vsel %vm709_vm2, 1, %v1654_v3 }
 0x723   : > { %v712_v6 = vshrl.u32 %v710_v58, 16  ;;  %v711_v9 = vand.u32 65535, %v710_v58 }
 0x725   : > { %v714_v7 = vcvt.s32.f32 %v712_v6  ;;  %v713_v12 = vcvt.s32.f32 %v711_v9 }
 0x727   : > { %717 = vadd.xlane.f32.xlu1 %v714_v7 }
 0x72b   : > { %715 = vadd.xlane.f32.xlu1 %v713_v12 }
 0x7b4   : > { %v718_v57 = vpop.xlane.xlu1 %717 }
 0x7b5   : > { %v720_v15 = vcvt.f32.s32 %v718_v57 }
 0x7b7   : > { %v721_v17 = vshll.u32 %v720_v15, 16 }
 0x7b8   : > { %v716_v16 = vpop.xlane.xlu1 %715 }
 0x7b9   : > { %v719_v18 = vcvt.f32.s32 %v716_v16 }
 0x7bb   : > { %v722_v19 = vadd.s32 %v721_v17, %v719_v18 }
 0x7bd   : > { %vm723_vm3 = vcmp.ge.s32.totalorder %v722_v19, %v2037_v8 }
 0x7be   : > { %v724_v20 = vsel %vm723_vm3, %v708_v4, %v707_v2 }
 0x7bf   : > { %v725_v21 = vor.u32 16777216, %v724_v20 }
 0x7c1   : > { %vm726_vm4 = vcmp.ge.s32.totalorder %v2026_v52, %v725_v21 }
 0x7c2   : > { %v727_v22 = vsel %vm726_vm4, 1, %v1654_v3 }
 0x7c3   : > { %v729_v23 = vshrl.u32 %v727_v22, 16  ;;  %v728_v27 = vand.u32 65535, %v727_v22 }
 0x7c5   : > { %v731_v26 = vcvt.s32.f32 %v729_v23  ;;  %v730_v28 = vcvt.s32.f32 %v728_v27 }
 0x7c7   : > { %734 = vadd.xlane.f32.xlu1 %v731_v26 }
 0x7cb   : > { %732 = vadd.xlane.f32.xlu1 %v730_v28 }
 0x854   : > { %v735_v29 = vpop.xlane.xlu1 %734 }
 0x855   : > { %v737_v30 = vcvt.f32.s32 %v735_v29 }
 0x857   : > { %v738_v32 = vshll.u32 %v737_v30, 16 }
 0x858   : > { %v733_v31 = vpop.xlane.xlu1 %732 }
 0x859   : > { %v736_v33 = vcvt.f32.s32 %v733_v31 }
 0x85b   : > { %v739_v34 = vadd.s32 %v738_v32, %v736_v33 }
 0x85d   : > { %vm740_vm5 = vcmp.ge.s32.totalorder %v739_v34, %v2037_v8 }
 0x85e   : > { %v741_v35 = vsel %vm740_vm5, %v725_v21, %v724_v20 }
 0x85f   : > { %v742_v36 = vor.u32 8388608, %v741_v35 }
 0x861   : > { %vm743_vm6 = vcmp.ge.s32.totalorder %v2026_v52, %v742_v36 }
 0x862   : > { %v744_v37 = vsel %vm743_vm6, 1, %v1654_v3 }
 0x863   : > { %v746_v38 = vshrl.u32 %v744_v37, 16  ;;  %v745_v40 = vand.u32 65535, %v744_v37 }
 0x865   : > { %v748_v39 = vcvt.s32.f32 %v746_v38  ;;  %v747_v41 = vcvt.s32.f32 %v745_v40 }
 0x867   : > { %751 = vadd.xlane.f32.xlu1 %v748_v39 }
 0x86b   : > { %749 = vadd.xlane.f32.xlu1 %v747_v41 }
 0x8f4   : > { %v752_v43 = vpop.xlane.xlu1 %751 }
 0x8f5   : > { %v754_v5 = vcvt.f32.s32 %v752_v43 }
 0x8f7   : > { %v755_v45 = vshll.u32 %v754_v5, 16 }
 0x8f8   : > { %v750_v44 = vpop.xlane.xlu1 %749 }
 0x8f9   : > { %v753_v46 = vcvt.f32.s32 %v750_v44 }
 0x8fb   : > { %v756_v47 = vadd.s32 %v755_v45, %v753_v46 }
 0x8fd   : > { %vm757_vm7 = vcmp.ge.s32.totalorder %v756_v47, %v2037_v8 }
 0x8fe   : > { %v758_v48 = vsel %vm757_vm7, %v742_v36, %v741_v35 }
 0x8ff   : > { %v759_v49 = vor.u32 4194304, %v758_v48 }
 0x901   : > { %vm760_vm8 = vcmp.ge.s32.totalorder %v2026_v52, %v759_v49 }
 0x902   : > { %v761_v50 = vsel %vm760_vm8, 1, %v1654_v3 }
 0x903   : > { %v763_v53 = vshrl.u32 %v761_v50, 16  ;;  %v762_v55 = vand.u32 65535, %v761_v50 }
 0x905   : > { %v765_v54 = vcvt.s32.f32 %v763_v53  ;;  %v764_v56 = vcvt.s32.f32 %v762_v55 }
 0x907   : > { %768 = vadd.xlane.f32.xlu1 %v765_v54 }
 0x90b   : > { %766 = vadd.xlane.f32.xlu1 %v764_v56 }
 0x994   : > { %v769_v14 = vpop.xlane.xlu1 %768 }
 0x995   : > { %v771_v42 = vcvt.f32.s32 %v769_v14 }
 0x997   : > { %v772_v59 = vshll.u32 %v771_v42, 16 }
 0x998   : > { %v767_v13 = vpop.xlane.xlu1 %766 }
 0x999   : > { %v770_v60 = vcvt.f32.s32 %v767_v13 }
 0x99b   : > { %v773_v24 = vadd.s32 %v772_v59, %v770_v60 }
 0x99d   : > { %vm774_vm9 = vcmp.ge.s32.totalorder %v773_v24, %v2037_v8 }
 0x99e   : > { %v775_v61 = vsel %vm774_vm9, %v759_v49, %v758_v48 }
 0x99f   : > { %v776_v10 = vor.u32 2097152, %v775_v61 }
 0x9a1   : > { %vm777_vm10 = vcmp.ge.s32.totalorder %v2026_v52, %v776_v10 }
 0x9a2   : > { %v778_v62 = vsel %vm777_vm10, 1, %v1654_v3 }
 0x9a3   : > { %v780_v63 = vshrl.u32 %v778_v62, 16  ;;  %v779_v1 = vand.u32 65535, %v778_v62 }
 0x9a5   : > { %v782_v2 = vcvt.s32.f32 %v780_v63  ;;  %v781_v4 = vcvt.s32.f32 %v779_v1 }
 0x9a7   : > { %785 = vadd.xlane.f32.xlu0 %v782_v2  ;;  %783 = vadd.xlane.f32.xlu1 %v781_v4 }
 0xa34   : > { %v786_v58 = vpop.xlane.xlu0 %785  ;;  %v784_v6 = vpop.xlane.xlu1 %783 }
 0xa35   : > { %v788_v7 = vcvt.f32.s32 %v786_v58  ;;  %v787_v12 = vcvt.f32.s32 %v784_v6 }
 0xa37   : > { %v789_v9 = vshll.u32 %v788_v7, 16 }
 0xa39   : > { %v790_v57 = vadd.s32 %v789_v9, %v787_v12 }
 0xa3b   : > { %vm791_vm11 = vcmp.ge.s32.totalorder %v790_v57, %v2037_v8 }
 0xa3c   : > { %v792_v15 = vsel %vm791_vm11, %v776_v10, %v775_v61 }
 0xa3d   : > { %v793_v16 = vor.u32 1048576, %v792_v15 }
 0xa3f   : > { %vm794_vm12 = vcmp.ge.s32.totalorder %v2026_v52, %v793_v16 }
 0xa40   : > { %v795_v17 = vsel %vm794_vm12, 1, %v1654_v3 }
 0xa41   : > { %v797_v18 = vshrl.u32 %v795_v17, 16  ;;  %v796_v19 = vand.u32 65535, %v795_v17 }
 0xa43   : > { %v799_v20 = vcvt.s32.f32 %v797_v18  ;;  %v798_v21 = vcvt.s32.f32 %v796_v19 }
 0xa45   : > { %802 = vadd.xlane.f32.xlu0 %v799_v20  ;;  %800 = vadd.xlane.f32.xlu1 %v798_v21 }
 0xad2   : > { %v803_v22 = vpop.xlane.xlu0 %802  ;;  %v801_v23 = vpop.xlane.xlu1 %800 }
 0xad3   : > { %v805_v26 = vcvt.f32.s32 %v803_v22  ;;  %v804_v28 = vcvt.f32.s32 %v801_v23 }
 0xad5   : > { %v806_v27 = vshll.u32 %v805_v26, 16 }
 0xad7   : > { %v807_v29 = vadd.s32 %v806_v27, %v804_v28 }
 0xad9   : > { %vm808_vm13 = vcmp.ge.s32.totalorder %v807_v29, %v2037_v8 }
 0xada   : > { %v809_v30 = vsel %vm808_vm13, %v793_v16, %v792_v15 }
 0xadb   : > { %v810_v31 = vor.u32 524288, %v809_v30 }
 0xadd   : > { %vm811_vm14 = vcmp.ge.s32.totalorder %v2026_v52, %v810_v31 }
 0xade   : > { %v812_v32 = vsel %vm811_vm14, 1, %v1654_v3 }
 0xadf   : > { %v814_v33 = vshrl.u32 %v812_v32, 16  ;;  %v813_v34 = vand.u32 65535, %v812_v32 }
 0xae1   : > { %v816_v35 = vcvt.s32.f32 %v814_v33  ;;  %v815_v36 = vcvt.s32.f32 %v813_v34 }
 0xae3   : > { %819 = vadd.xlane.f32.xlu0 %v816_v35  ;;  %817 = vadd.xlane.f32.xlu1 %v815_v36 }
 0xb70   : > { %v820_v37 = vpop.xlane.xlu0 %819  ;;  %v818_v38 = vpop.xlane.xlu1 %817 }
 0xb71   : > { %v822_v39 = vcvt.f32.s32 %v820_v37  ;;  %v821_v41 = vcvt.f32.s32 %v818_v38 }
 0xb73   : > { %v823_v40 = vshll.u32 %v822_v39, 16 }
 0xb75   : > { %v824_v43 = vadd.s32 %v823_v40, %v821_v41 }
 0xb77   : > { %vm825_vm15 = vcmp.ge.s32.totalorder %v824_v43, %v2037_v8 }
 0xb78   : > { %v826_v5 = vsel %vm825_vm15, %v810_v31, %v809_v30 }
 0xb79   : > { %v827_v44 = vor.u32 262144, %v826_v5 }
 0xb7b   : > { %vm828_vm0 = vcmp.ge.s32.totalorder %v2026_v52, %v827_v44 }
 0xb7c   : > { %v829_v45 = vsel %vm828_vm0, 1, %v1654_v3 }
 0xb7d   : > { %v831_v46 = vshrl.u32 %v829_v45, 16  ;;  %v830_v47 = vand.u32 65535, %v829_v45 }
 0xb7f   : > { %v833_v48 = vcvt.s32.f32 %v831_v46  ;;  %v832_v49 = vcvt.s32.f32 %v830_v47 }
 0xb81   : > { %836 = vadd.xlane.f32.xlu0 %v833_v48  ;;  %834 = vadd.xlane.f32.xlu1 %v832_v49 }
 0xc0e   : > { %v837_v50 = vpop.xlane.xlu0 %836  ;;  %v835_v53 = vpop.xlane.xlu1 %834 }
 0xc0f   : > { %v839_v54 = vcvt.f32.s32 %v837_v50  ;;  %v838_v56 = vcvt.f32.s32 %v835_v53 }
 0xc11   : > { %v840_v55 = vshll.u32 %v839_v54, 16 }
 0xc13   : > { %v841_v14 = vadd.s32 %v840_v55, %v838_v56 }
 0xc15   : > { %vm842_vm1 = vcmp.ge.s32.totalorder %v841_v14, %v2037_v8 }
 0xc16   : > { %v843_v42 = vsel %vm842_vm1, %v827_v44, %v826_v5 }
 0xc17   : > { %v844_v13 = vor.u32 131072, %v843_v42 }
 0xc19   : > { %vm845_vm2 = vcmp.ge.s32.totalorder %v2026_v52, %v844_v13 }
 0xc1a   : > { %v846_v59 = vsel %vm845_vm2, 1, %v1654_v3 }
 0xc1b   : > { %v848_v60 = vshrl.u32 %v846_v59, 16  ;;  %v847_v24 = vand.u32 65535, %v846_v59 }
 0xc1d   : > { %v850_v61 = vcvt.s32.f32 %v848_v60  ;;  %v849_v10 = vcvt.s32.f32 %v847_v24 }
 0xc1f   : > { %853 = vadd.xlane.f32.xlu0 %v850_v61  ;;  %851 = vadd.xlane.f32.xlu1 %v849_v10 }
 0xcac   : > { %v854_v62 = vpop.xlane.xlu0 %853  ;;  %v852_v63 = vpop.xlane.xlu1 %851 }
 0xcad   : > { %v856_v1 = vcvt.f32.s32 %v854_v62  ;;  %v855_v4 = vcvt.f32.s32 %v852_v63 }
 0xcaf   : > { %v857_v2 = vshll.u32 %v856_v1, 16 }
 0xcb1   : > { %v858_v58 = vadd.s32 %v857_v2, %v855_v4 }
 0xcb3   : > { %vm859_vm3 = vcmp.ge.s32.totalorder %v858_v58, %v2037_v8 }
 0xcb4   : > { %v860_v6 = vsel %vm859_vm3, %v844_v13, %v843_v42 }
 0xcb5   : > { %v861_v7 = vor.u32 65536, %v860_v6 }
 0xcb7   : > { %vm862_vm4 = vcmp.ge.s32.totalorder %v2026_v52, %v861_v7 }
 0xcb8   : > { %v863_v9 = vsel %vm862_vm4, 1, %v1654_v3 }
 0xcb9   : > { %v865_v12 = vshrl.u32 %v863_v9, 16  ;;  %v864_v57 = vand.u32 65535, %v863_v9 }
 0xcbb   : > { %v867_v15 = vcvt.s32.f32 %v865_v12  ;;  %v866_v16 = vcvt.s32.f32 %v864_v57 }
 0xcbd   : > { %870 = vadd.xlane.f32.xlu0 %v867_v15  ;;  %868 = vadd.xlane.f32.xlu1 %v866_v16 }
 0xd4a   : > { %v871_v17 = vpop.xlane.xlu0 %870  ;;  %v869_v18 = vpop.xlane.xlu1 %868 }
 0xd4b   : > { %v873_v19 = vcvt.f32.s32 %v871_v17  ;;  %v872_v21 = vcvt.f32.s32 %v869_v18 }
 0xd4d   : > { %v874_v20 = vshll.u32 %v873_v19, 16 }
 0xd4f   : > { %v875_v22 = vadd.s32 %v874_v20, %v872_v21 }
 0xd51   : > { %vm876_vm5 = vcmp.ge.s32.totalorder %v875_v22, %v2037_v8 }
 0xd52   : > { %v877_v23 = vsel %vm876_vm5, %v861_v7, %v860_v6 }
 0xd53   : > { %v878_v26 = vor.u32 32768, %v877_v23 }
 0xd55   : > { %vm879_vm6 = vcmp.ge.s32.totalorder %v2026_v52, %v878_v26 }
 0xd56   : > { %v880_v27 = vsel %vm879_vm6, 1, %v1654_v3 }
 0xd57   : > { %v882_v28 = vshrl.u32 %v880_v27, 16  ;;  %v881_v29 = vand.u32 65535, %v880_v27 }
 0xd59   : > { %v884_v30 = vcvt.s32.f32 %v882_v28  ;;  %v883_v31 = vcvt.s32.f32 %v881_v29 }
 0xd5b   : > { %887 = vadd.xlane.f32.xlu0 %v884_v30  ;;  %885 = vadd.xlane.f32.xlu1 %v883_v31 }
 0xde8   : > { %v888_v32 = vpop.xlane.xlu0 %887  ;;  %v886_v33 = vpop.xlane.xlu1 %885 }
 0xde9   : > { %v890_v34 = vcvt.f32.s32 %v888_v32  ;;  %v889_v36 = vcvt.f32.s32 %v886_v33 }
 0xdeb   : > { %v891_v35 = vshll.u32 %v890_v34, 16 }
 0xded   : > { %v892_v37 = vadd.s32 %v891_v35, %v889_v36 }
 0xdef   : > { %vm893_vm7 = vcmp.ge.s32.totalorder %v892_v37, %v2037_v8 }
 0xdf0   : > { %v894_v38 = vsel %vm893_vm7, %v878_v26, %v877_v23 }
 0xdf1   : > { %v895_v39 = vor.u32 16384, %v894_v38 }
 0xdf3   : > { %vm896_vm8 = vcmp.ge.s32.totalorder %v2026_v52, %v895_v39 }
 0xdf4   : > { %v897_v40 = vsel %vm896_vm8, 1, %v1654_v3 }
 0xdf5   : > { %v899_v41 = vshrl.u32 %v897_v40, 16  ;;  %v898_v43 = vand.u32 65535, %v897_v40 }
 0xdf7   : > { %v901_v5 = vcvt.s32.f32 %v899_v41  ;;  %v900_v44 = vcvt.s32.f32 %v898_v43 }
 0xdf9   : > { %904 = vadd.xlane.f32.xlu0 %v901_v5  ;;  %902 = vadd.xlane.f32.xlu1 %v900_v44 }
 0xe86   : > { %v905_v45 = vpop.xlane.xlu0 %904  ;;  %v903_v46 = vpop.xlane.xlu1 %902 }
 0xe87   : > { %v907_v47 = vcvt.f32.s32 %v905_v45  ;;  %v906_v49 = vcvt.f32.s32 %v903_v46 }
 0xe89   : > { %v908_v48 = vshll.u32 %v907_v47, 16 }
 0xe8b   : > { %v909_v50 = vadd.s32 %v908_v48, %v906_v49 }
 0xe8d   : > { %vm910_vm9 = vcmp.ge.s32.totalorder %v909_v50, %v2037_v8 }
 0xe8e   : > { %v911_v53 = vsel %vm910_vm9, %v895_v39, %v894_v38 }
 0xe8f   : > { %v912_v54 = vor.u32 8192, %v911_v53 }
 0xe91   : > { %vm913_vm10 = vcmp.ge.s32.totalorder %v2026_v52, %v912_v54 }
 0xe92   : > { %v914_v55 = vsel %vm913_vm10, 1, %v1654_v3 }
 0xe93   : > { %v916_v56 = vshrl.u32 %v914_v55, 16  ;;  %v915_v14 = vand.u32 65535, %v914_v55 }
 0xe95   : > { %v918_v42 = vcvt.s32.f32 %v916_v56  ;;  %v917_v13 = vcvt.s32.f32 %v915_v14 }
 0xe97   : > { %921 = vadd.xlane.f32.xlu0 %v918_v42  ;;  %919 = vadd.xlane.f32.xlu1 %v917_v13 }
 0xf24   : > { %v922_v59 = vpop.xlane.xlu0 %921  ;;  %v920_v60 = vpop.xlane.xlu1 %919 }
 0xf25   : > { %v924_v24 = vcvt.f32.s32 %v922_v59  ;;  %v923_v10 = vcvt.f32.s32 %v920_v60 }
 0xf27   : > { %v925_v61 = vshll.u32 %v924_v24, 16 }
 0xf29   : > { %v926_v62 = vadd.s32 %v925_v61, %v923_v10 }
 0xf2b   : > { %vm927_vm11 = vcmp.ge.s32.totalorder %v926_v62, %v2037_v8 }
 0xf2c   : > { %v928_v63 = vsel %vm927_vm11, %v912_v54, %v911_v53 }
 0xf2d   : > { %v929_v1 = vor.u32 4096, %v928_v63 }
 0xf2f   : > { %vm930_vm12 = vcmp.ge.s32.totalorder %v2026_v52, %v929_v1 }
 0xf30   : > { %v931_v2 = vsel %vm930_vm12, 1, %v1654_v3 }
 0xf31   : > { %v933_v4 = vshrl.u32 %v931_v2, 16  ;;  %v932_v58 = vand.u32 65535, %v931_v2 }
 0xf33   : > { %v935_v6 = vcvt.s32.f32 %v933_v4  ;;  %v934_v7 = vcvt.s32.f32 %v932_v58 }
 0xf35   : > { %938 = vadd.xlane.f32.xlu0 %v935_v6  ;;  %936 = vadd.xlane.f32.xlu1 %v934_v7 }
 0xfc2   : > { %v939_v9 = vpop.xlane.xlu0 %938  ;;  %v937_v12 = vpop.xlane.xlu1 %936 }
 0xfc3   : > { %v941_v57 = vcvt.f32.s32 %v939_v9  ;;  %v940_v16 = vcvt.f32.s32 %v937_v12 }
 0xfc5   : > { %v942_v15 = vshll.u32 %v941_v57, 16 }
 0xfc7   : > { %v943_v17 = vadd.s32 %v942_v15, %v940_v16 }
 0xfc9   : > { %vm944_vm13 = vcmp.ge.s32.totalorder %v943_v17, %v2037_v8 }
 0xfca   : > { %v945_v18 = vsel %vm944_vm13, %v929_v1, %v928_v63 }
 0xfcb   : > { %v946_v19 = vor.u32 2048, %v945_v18 }
 0xfcd   : > { %vm947_vm14 = vcmp.ge.s32.totalorder %v2026_v52, %v946_v19 }
 0xfce   : > { %v948_v20 = vsel %vm947_vm14, 1, %v1654_v3 }
 0xfcf   : > { %v950_v21 = vshrl.u32 %v948_v20, 16  ;;  %v949_v22 = vand.u32 65535, %v948_v20 }
 0xfd1   : > { %v952_v23 = vcvt.s32.f32 %v950_v21  ;;  %v951_v26 = vcvt.s32.f32 %v949_v22 }
 0xfd3   : > { %955 = vadd.xlane.f32.xlu0 %v952_v23  ;;  %953 = vadd.xlane.f32.xlu1 %v951_v26 }
0x1060   : > { %v956_v27 = vpop.xlane.xlu0 %955  ;;  %v954_v28 = vpop.xlane.xlu1 %953 }
0x1061   : > { %v958_v29 = vcvt.f32.s32 %v956_v27  ;;  %v957_v31 = vcvt.f32.s32 %v954_v28 }
0x1063   : > { %v959_v30 = vshll.u32 %v958_v29, 16 }
0x1065   : > { %v960_v32 = vadd.s32 %v959_v30, %v957_v31 }
0x1067   : > { %vm961_vm15 = vcmp.ge.s32.totalorder %v960_v32, %v2037_v8 }
0x1068   : > { %v962_v33 = vsel %vm961_vm15, %v946_v19, %v945_v18 }
0x1069   : > { %v963_v34 = vor.u32 1024, %v962_v33 }
0x106b   : > { %vm964_vm0 = vcmp.ge.s32.totalorder %v2026_v52, %v963_v34 }
0x106c   : > { %v965_v35 = vsel %vm964_vm0, 1, %v1654_v3 }
0x106d   : > { %v967_v36 = vshrl.u32 %v965_v35, 16  ;;  %v966_v37 = vand.u32 65535, %v965_v35 }
0x106f   : > { %v969_v38 = vcvt.s32.f32 %v967_v36  ;;  %v968_v39 = vcvt.s32.f32 %v966_v37 }
0x1071   : > { %972 = vadd.xlane.f32.xlu0 %v969_v38  ;;  %970 = vadd.xlane.f32.xlu1 %v968_v39 }
0x10fe   : > { %v973_v40 = vpop.xlane.xlu0 %972  ;;  %v971_v41 = vpop.xlane.xlu1 %970 }
0x10ff   : > { %v975_v43 = vcvt.f32.s32 %v973_v40  ;;  %v974_v44 = vcvt.f32.s32 %v971_v41 }
0x1101   : > { %v976_v5 = vshll.u32 %v975_v43, 16 }
0x1103   : > { %v977_v45 = vadd.s32 %v976_v5, %v974_v44 }
0x1105   : > { %vm978_vm1 = vcmp.ge.s32.totalorder %v977_v45, %v2037_v8 }
0x1106   : > { %v979_v46 = vsel %vm978_vm1, %v963_v34, %v962_v33 }
0x1107   : > { %v980_v47 = vor.u32 512, %v979_v46 }
0x1109   : > { %vm981_vm2 = vcmp.ge.s32.totalorder %v2026_v52, %v980_v47 }
0x110a   : > { %v982_v48 = vsel %vm981_vm2, 1, %v1654_v3 }
0x110b   : > { %v984_v49 = vshrl.u32 %v982_v48, 16  ;;  %v983_v50 = vand.u32 65535, %v982_v48 }
0x110d   : > { %v986_v53 = vcvt.s32.f32 %v984_v49  ;;  %v985_v54 = vcvt.s32.f32 %v983_v50 }
0x110f   : > { %989 = vadd.xlane.f32.xlu0 %v986_v53  ;;  %987 = vadd.xlane.f32.xlu1 %v985_v54 }
0x119c   : > { %v990_v55 = vpop.xlane.xlu0 %989  ;;  %v988_v56 = vpop.xlane.xlu1 %987 }
0x119d   : > { %v992_v14 = vcvt.f32.s32 %v990_v55  ;;  %v991_v13 = vcvt.f32.s32 %v988_v56 }
0x119f   : > { %v993_v42 = vshll.u32 %v992_v14, 16 }
0x11a1   : > { %v994_v59 = vadd.s32 %v993_v42, %v991_v13 }
0x11a3   : > { %vm995_vm3 = vcmp.ge.s32.totalorder %v994_v59, %v2037_v8 }
0x11a4   : > { %v996_v60 = vsel %vm995_vm3, %v980_v47, %v979_v46 }
0x11a5   : > { %v997_v24 = vor.u32 256, %v996_v60 }
0x11a7   : > { %vm998_vm4 = vcmp.ge.s32.totalorder %v2026_v52, %v997_v24 }
0x11a8   : > { %v999_v61 = vsel %vm998_vm4, 1, %v1654_v3 }
0x11a9   : > { %v1001_v10 = vshrl.u32 %v999_v61, 16  ;;  %v1000_v62 = vand.u32 65535, %v999_v61 }
0x11ab   : > { %v1003_v63 = vcvt.s32.f32 %v1001_v10  ;;  %v1002_v1 = vcvt.s32.f32 %v1000_v62 }
0x11ad   : > { %1006 = vadd.xlane.f32.xlu0 %v1003_v63  ;;  %1004 = vadd.xlane.f32.xlu1 %v1002_v1 }
0x123a   : > { %v1007_v2 = vpop.xlane.xlu0 %1006  ;;  %v1005_v4 = vpop.xlane.xlu1 %1004 }
0x123b   : > { %v1009_v58 = vcvt.f32.s32 %v1007_v2  ;;  %v1008_v7 = vcvt.f32.s32 %v1005_v4 }
0x123d   : > { %v1010_v6 = vshll.u32 %v1009_v58, 16 }
0x123f   : > { %v1011_v9 = vadd.s32 %v1010_v6, %v1008_v7 }
0x1241   : > { %vm1012_vm5 = vcmp.ge.s32.totalorder %v1011_v9, %v2037_v8 }
0x1242   : > { %v1013_v12 = vsel %vm1012_vm5, %v997_v24, %v996_v60  ;;  %vm566_vm5 = vcmask 1040384  }
0x1243   : > { %v1014_v57 = vor.u32 128, %v1013_v12 }
0x1245   : > { %vm1015_vm6 = vcmp.ge.s32.totalorder %v2026_v52, %v1014_v57 }
0x1246   : > { %v1016_v15 = vsel %vm1015_vm6, 1, %v1654_v3 }
0x1247   : > { %v1018_v16 = vshrl.u32 %v1016_v15, 16  ;;  %v1017_v17 = vand.u32 65535, %v1016_v15 }
0x1249   : > { %v1020_v18 = vcvt.s32.f32 %v1018_v16  ;;  %v1019_v19 = vcvt.s32.f32 %v1017_v17 }
0x124b   : > { %1023 = vadd.xlane.f32.xlu0 %v1020_v18  ;;  %1021 = vadd.xlane.f32.xlu1 %v1019_v19 }
0x12d8   : > { %v1024_v20 = vpop.xlane.xlu0 %1023  ;;  %v1022_v21 = vpop.xlane.xlu1 %1021 }
0x12d9   : > { %v1026_v22 = vcvt.f32.s32 %v1024_v20  ;;  %v1025_v26 = vcvt.f32.s32 %v1022_v21 }
0x12db   : > { %v1027_v23 = vshll.u32 %v1026_v22, 16 }
0x12dd   : > { %v1028_v27 = vadd.s32 %v1027_v23, %v1025_v26 }
0x12df   : > { %vm1029_vm7 = vcmp.ge.s32.totalorder %v1028_v27, %v2037_v8 }
0x12e0   : > { %v1030_v28 = vsel %vm1029_vm7, %v1014_v57, %v1013_v12 }
0x12e1   : > { %v1031_v29 = vor.u32 64, %v1030_v28 }
0x12e3   : > { %vm1032_vm8 = vcmp.ge.s32.totalorder %v2026_v52, %v1031_v29 }
0x12e4   : > { %v1033_v30 = vsel %vm1032_vm8, 1, %v1654_v3 }
0x12e5   : > { %v1035_v31 = vshrl.u32 %v1033_v30, 16  ;;  %v1034_v32 = vand.u32 65535, %v1033_v30 }
0x12e7   : > { %v1037_v33 = vcvt.s32.f32 %v1035_v31  ;;  %v1036_v34 = vcvt.s32.f32 %v1034_v32 }
0x12e9   : > { %1040 = vadd.xlane.f32.xlu0 %v1037_v33  ;;  %1038 = vadd.xlane.f32.xlu1 %v1036_v34 }
0x1376   : > { %v1041_v35 = vpop.xlane.xlu0 %1040  ;;  %v1039_v36 = vpop.xlane.xlu1 %1038 }
0x1377   : > { %v1043_v37 = vcvt.f32.s32 %v1041_v35  ;;  %v1042_v39 = vcvt.f32.s32 %v1039_v36 }
0x1379   : > { %v1044_v38 = vshll.u32 %v1043_v37, 16 }
0x137b   : > { %v1045_v40 = vadd.s32 %v1044_v38, %v1042_v39 }
0x137d   : > { %vm1046_vm9 = vcmp.ge.s32.totalorder %v1045_v40, %v2037_v8 }
0x137e   : > { %v1047_v41 = vsel %vm1046_vm9, %v1031_v29, %v1030_v28  ;;  %vm1185_vm9 = vcmp.eq.s32.totalorder %v1914_v11, 2 }
0x137f   : > { %v1048_v43 = vor.u32 32, %v1047_v41 }
0x1381   : > { %vm1049_vm10 = vcmp.ge.s32.totalorder %v2026_v52, %v1048_v43 }
0x1382   : > { %v1050_v5 = vsel %vm1049_vm10, 1, %v1654_v3  ;;  %vm1184_vm10 = vcmp.eq.s32.totalorder %v1914_v11, 1 }
0x1383   : > { %v1052_v44 = vshrl.u32 %v1050_v5, 16  ;;  %v1051_v45 = vand.u32 65535, %v1050_v5 }
0x1385   : > { %v1054_v46 = vcvt.s32.f32 %v1052_v44  ;;  %v1053_v47 = vcvt.s32.f32 %v1051_v45 }
0x1387   : > { %1057 = vadd.xlane.f32.xlu0 %v1054_v46  ;;  %1055 = vadd.xlane.f32.xlu1 %v1053_v47 }
0x1414   : > { %v1058_v48 = vpop.xlane.xlu0 %1057  ;;  %v1056_v49 = vpop.xlane.xlu1 %1055 }
0x1415   : > { %v1060_v50 = vcvt.f32.s32 %v1058_v48  ;;  %v1059_v54 = vcvt.f32.s32 %v1056_v49 }
0x1417   : > { %v1061_v53 = vshll.u32 %v1060_v50, 16 }
0x1419   : > { %v1062_v55 = vadd.s32 %v1061_v53, %v1059_v54 }
0x141b   : > { %vm1063_vm11 = vcmp.ge.s32.totalorder %v1062_v55, %v2037_v8 }
0x141c   : > { %v1064_v56 = vsel %vm1063_vm11, %v1048_v43, %v1047_v41  ;;  %vm1183_vm11 = vcmp.eq.s32.totalorder %v1914_v11, 0 }
0x141d   : > { %v1065_v14 = vor.u32 16, %v1064_v56 }
0x141f   : > { %vm1066_vm12 = vcmp.ge.s32.totalorder %v2026_v52, %v1065_v14 }
0x1420   : > { %v1067_v42 = vsel %vm1066_vm12, 1, %v1654_v3 }
0x1421   : > { %v1069_v13 = vshrl.u32 %v1067_v42, 16  ;;  %v1068_v59 = vand.u32 65535, %v1067_v42  ;;  %v567_v42 = vsel %vm566_vm5, %v2032_v0, 0.0 }
0x1423   : > { %v1071_v60 = vcvt.s32.f32 %v1069_v13  ;;  %v1070_v24 = vcvt.s32.f32 %v1068_v59 }
0x1425   : > { %1074 = vadd.xlane.f32.xlu0 %v1071_v60  ;;  %1072 = vadd.xlane.f32.xlu1 %v1070_v24 }
0x14b2   : > { %v1075_v61 = vpop.xlane.xlu0 %1074  ;;  %v1073_v10 = vpop.xlane.xlu1 %1072 }
0x14b3   : > { %v1077_v62 = vcvt.f32.s32 %v1075_v61  ;;  %v1076_v1 = vcvt.f32.s32 %v1073_v10 }
0x14b5   : > { %v1078_v63 = vshll.u32 %v1077_v62, 16 }
0x14b7   : > { %v1079_v2 = vadd.s32 %v1078_v63, %v1076_v1 }
0x14b9   : > { %vm1080_vm13 = vcmp.ge.s32.totalorder %v1079_v2, %v2037_v8 }
0x14ba   : > { %v1081_v4 = vsel %vm1080_vm13, %v1065_v14, %v1064_v56 }
0x14bb   : > { %v1082_v58 = vor.u32 8, %v1081_v4 }
0x14bd   : > { %vm1083_vm14 = vcmp.ge.s32.totalorder %v2026_v52, %v1082_v58 }
0x14be   : > { %v1084_v6 = vsel %vm1083_vm14, 1, %v1654_v3 }
0x14bf   : > { %v1086_v7 = vshrl.u32 %v1084_v6, 16  ;;  %v1085_v9 = vand.u32 65535, %v1084_v6 }
0x14c1   : > { %v1088_v12 = vcvt.s32.f32 %v1086_v7  ;;  %v1087_v57 = vcvt.s32.f32 %v1085_v9 }
0x14c3   : > { %1091 = vadd.xlane.f32.xlu0 %v1088_v12  ;;  %1089 = vadd.xlane.f32.xlu1 %v1087_v57 }
0x1550   : > { %v1092_v15 = vpop.xlane.xlu0 %1091  ;;  %v1090_v16 = vpop.xlane.xlu1 %1089 }
0x1551   : > { %v1094_v17 = vcvt.f32.s32 %v1092_v15  ;;  %v1093_v19 = vcvt.f32.s32 %v1090_v16 }
0x1553   : > { %v1095_v18 = vshll.u32 %v1094_v17, 16 }
0x1555   : > { %v1096_v20 = vadd.s32 %v1095_v18, %v1093_v19 }
0x1557   : > { %vm1097_vm15 = vcmp.ge.s32.totalorder %v1096_v20, %v2037_v8 }
0x1558   : > { %v1098_v21 = vsel %vm1097_vm15, %v1082_v58, %v1081_v4 }
0x1559   : > { %v1099_v22 = vor.u32 4, %v1098_v21 }
0x155b   : > { %vm1100_vm0 = vcmp.ge.s32.totalorder %v2026_v52, %v1099_v22 }
0x155c   : > { %v1101_v23 = vsel %vm1100_vm0, 1, %v1654_v3 }
0x155d   : > { %v1103_v26 = vshrl.u32 %v1101_v23, 16  ;;  %v1102_v27 = vand.u32 65535, %v1101_v23 }
0x155f   : > { %v1105_v28 = vcvt.s32.f32 %v1103_v26  ;;  %v1104_v29 = vcvt.s32.f32 %v1102_v27 }
0x1561   : > { %1108 = vadd.xlane.f32.xlu0 %v1105_v28  ;;  %1106 = vadd.xlane.f32.xlu1 %v1104_v29 }
0x15ee   : > { %v1109_v30 = vpop.xlane.xlu0 %1108  ;;  %v1107_v31 = vpop.xlane.xlu1 %1106 }
0x15ef   : > { %v1111_v32 = vcvt.f32.s32 %v1109_v30  ;;  %v1110_v34 = vcvt.f32.s32 %v1107_v31 }
0x15f1   : > { %v1112_v33 = vshll.u32 %v1111_v32, 16 }
0x15f3   : > { %v1113_v35 = vadd.s32 %v1112_v33, %v1110_v34 }
0x15f5   : > { %vm1114_vm1 = vcmp.ge.s32.totalorder %v1113_v35, %v2037_v8 }
0x15f6   : > { %v1115_v36 = vsel %vm1114_vm1, %v1099_v22, %v1098_v21 }
0x15f7   : > { %v1116_v37 = vor.u32 2, %v1115_v36 }
0x15f9   : > { %vm1117_vm2 = vcmp.ge.s32.totalorder %v2026_v52, %v1116_v37 }
0x15fa   : > { %v1118_v38 = vsel %vm1117_vm2, 1, %v1654_v3 }
0x15fb   : > { %v1120_v39 = vshrl.u32 %v1118_v38, 16  ;;  %v1119_v40 = vand.u32 65535, %v1118_v38 }
0x15fd   : > { %v1122_v41 = vcvt.s32.f32 %v1120_v39  ;;  %v1121_v43 = vcvt.s32.f32 %v1119_v40 }
0x15ff   : > { %1125 = vadd.xlane.f32.xlu0 %v1122_v41  ;;  %1123 = vadd.xlane.f32.xlu1 %v1121_v43 }
0x168c   : > { %v1126_v5 = vpop.xlane.xlu0 %1125  ;;  %v1124_v44 = vpop.xlane.xlu1 %1123 }
0x168d   : > { %v1128_v45 = vcvt.f32.s32 %v1126_v5  ;;  %v1127_v47 = vcvt.f32.s32 %v1124_v44 }
0x168f   : > { %v1129_v46 = vshll.u32 %v1128_v45, 16 }
0x1691   : > { %v1130_v48 = vadd.s32 %v1129_v46, %v1127_v47 }
0x1693   : > { %vm1131_vm3 = vcmp.ge.s32.totalorder %v1130_v48, %v2037_v8 }
0x1694   : > { %v1132_v49 = vsel %vm1131_vm3, %v1116_v37, %v1115_v36 }
0x1695   : > { %v1133_v50 = vor.u32 1, %v1132_v49 }
0x1697   : > { %vm1134_vm4 = vcmp.ge.s32.totalorder %v2026_v52, %v1133_v50 }
0x1698   : > { %v1135_v53 = vsel %vm1134_vm4, 1, %v1654_v3 }
0x1699   : > { %v1137_v54 = vshrl.u32 %v1135_v53, 16  ;;  %v1136_v55 = vand.u32 65535, %v1135_v53 }
0x169b   : > { %v1139_v56 = vcvt.s32.f32 %v1137_v54  ;;  %v1138_v14 = vcvt.s32.f32 %v1136_v55 }
0x169d   : > { %1142 = vadd.xlane.f32.xlu0 %v1139_v56  ;;  %1140 = vadd.xlane.f32.xlu1 %v1138_v14 }
0x16a1   : > { %568 = vadd.xlane.f32.xlu1 %v567_v42 }
0x172a   : > { %v1143_v13 = vpop.xlane.xlu0 %1142  ;;  %v1141_v59 = vpop.xlane.xlu1 %1140 }
0x172b   : > { %v1145_v60 = vcvt.f32.s32 %v1143_v13  ;;  %v1144_v61 = vcvt.f32.s32 %v1141_v59 }
0x172d   : > { %v1146_v24 = vshll.u32 %v1145_v60, 16 }
0x172e   : > { %v569_v10 = vpop.xlane.xlu1 %568 }
0x172f   : > { %v1147_v62 = vadd.s32 %v1146_v24, %v1144_v61  ;;  %v570_v63 = vrot.slane %v569_v10, 4 }
0x1731   : > { %vm1148_vm6 = vcmp.ge.s32.totalorder %v1147_v62, %v2037_v8  ;;  %v571_v1 = vadd.f32 %v570_v63, %v569_v10 }
0x1732   : > { %v1149_v2 = vsel %vm1148_vm6, %v1133_v50, %v1132_v49 }
0x1733   : > { %v572_v4 = vrot.slane %v571_v1, 2  ;;  %vm1150_vm7 = vcmp.gt.s32.totalorder %v2026_v52, %v1149_v2  ;;  %vm1167_vm8 = vcmp.eq.s32.totalorder %v2026_v52, %v1149_v2 }
0x1734   : > { %v1151_v58 = vsel %vm1150_vm7, 1, %v1654_v3  ;;  %v1164_v0 = vsel %vm1150_vm7, %v2026_v52, 0.0  ;;  %v1168_v17 = vsel %vm1167_vm8, %v2026_v52, 0.0 }
0x1735   : > { %1165 = vadd.xlane.f32.xlu1 %v1164_v0  ;;  %v1153_v6 = vshrl.u32 %v1151_v58, 16  ;;  %v573_v7 = vadd.f32 %v572_v4, %v571_v1  ;;  %v1152_v57 = vand.u32 65535, %v1151_v58 }
0x1737   : > { %v1155_v9 = vcvt.s32.f32 %v1153_v6  ;;  %v574_v12 = vrot.slane %v573_v7, 1  ;;  %v1154_v16 = vcvt.s32.f32 %v1152_v57 }
0x1739   : > { %1158 = vadd.xlane.f32.xlu0 %v1155_v9  ;;  %1174 = vadd.xlane.f32.xlu1 %v2024_v51  ;;  %v575_v15 = vadd.f32 %v574_v12, %v573_v7 }
0x173b   : > { %1353 = vpush %v575_v15 }
0x173d   : > { %1156 = vadd.xlane.f32.xlu0 %v1154_v16 }
0x1741   : > { %1169 = vmax.xlane.f32.xlu0 %v1168_v17 }
0x176c   : > { %s1354_s12 = spop %1353 }
0x17c2   : > { %v1166_v19 = vpop.xlane.xlu1 %1165 }
0x17c6   : > { %v1159_v3 = vpop.xlane.xlu0 %1158  ;;  %v1175_v51 = vpop.xlane.xlu1 %1174 }
0x17c7   : > { %v1161_v18 = vcvt.f32.s32 %v1159_v3  ;;  %v1176_v29 = vadd.f32 %v1175_v51, %v1166_v19 }
0x17c9   : > { %v1162_v21 = vshll.u32 %v1161_v18, 16 }
0x17ca   : > { %v1157_v20 = vpop.xlane.xlu0 %1156 }
0x17cb   : > { %v1160_v22 = vcvt.f32.s32 %v1157_v20 }
0x17cd   : > { %v1163_v23 = vadd.s32 %v1162_v21, %v1160_v22 }
0x17ce   : > { %v1170_v28 = vpop.xlane.xlu0 %1169 }
0x17cf   : > { %v1171_v26 = vsub.s32 %v2037_v8, %v1163_v23 }
0x17d1   : > { %v1172_v27 = vcvt.s32.f32 %v1171_v26 }
0x17d3   : > { %v1177_v30 = vmul.f32 %v1172_v27, %v1170_v28 }
0x17d5   : > { %v1178_v31 = vadd.f32 %v1177_v30, %v1176_v29 }
0x17d7   : > { %1355 = vpush %v1178_v31 }
0x17d8   : > { %1357 = vpush %v2034_v25  ;;  %v1190_v25 = vstv %s1354_s12 }
0x1808   : > { %s1356_s20 = spop %1355 }
0x1809   : > { %s1358_s21 = spop %1357  ;;  %v1188_v8 = vstv %s1356_s20 }
0x180a   : > { %s1182_s0 = scvt.s32.f32 %s1358_s21 }
0x180c   : > { %v1186_v52 = vstv %s1182_s0 }
0x180d   : > { %v1187_v32 = vsel %vm1185_vm9, %v1186_v52, 0.0 }
0x180e   : > { %v1189_v33 = vsel %vm1184_vm10, %v1188_v8, %v1187_v32 }
0x180f   : > { %v1191_v34 = vsel %vm1183_vm11, %v1190_v25, %v1189_v33 }
0x1810   : > { %1192 = vst [vmem:[%s293_s6] sm:$0xff] %v1191_v34 }
0x1811   : > { %1584 = shalt.err (!%p1581_p4)
}
0x1812   : > { %s1585_s8 = scalar_lea.hbm %s2149_s24, 128  ;;  %s1589_s13 = scalar_lea.hbm %s2197_s4, 256 }
0x1813   : > { %p1586_p9 = scmp.ne.s32.totalorder %s2149_s24, %s1585_s8  ;;  %p1590_p5 = scmp.lt.u32.totalorder %s2149_s24, %s2197_s4 }
0x1814   : > { %p1591_p3 = scmp.lt.u32.totalorder %s1589_s13, %s1585_s8  ;;  %p1593_p12 = scmp.lt.u32.totalorder %s1585_s8, %s2149_s24 }
0x1815   : > { %p1587_p10 = pnand %p1586_p9, %p2229_p13 }
0x1816   : > { %p1592_p11 = por %p1591_p3, %p1590_p5 }
0x1817   : > { %p1588_p8 = pneg %p1587_p10 }
0x1818   : > { %p1594_p0 = por %p1593_p12, %p1592_p11 }
0x181a   : > { %p1595_p6 = pnand %p1594_p0, %p1588_p8 }
0x181c   : > { %1598 = shalt.err (!%p1595_p6)
}
0x181d   : > { %1369 = dma.vmem_to_hbm [thread:$0]  (%p2229_p13), %s2151_s10, 128, %s2149_s24, %s1194_s27  }
0x181e PF: > { %s1219_s21 = sand.u32 1, %s1633_s15   ;;  %p2230_p7 = scmp.ne.s32.totalorder %s2214_s7, 0 }
0x181f   : > { %p2231_p1 = scmp.ge.s32.totalorder %s1645_s18, 2  ;;  %s1220_s0 = scalar_lea.sflag [#allocation4], %s1219_s21 }
0x1821   : > { %p1386_p2 = pnand %p2231_p1, %p2230_p7 }
0x1823   : > { %1628 = dma.done.wait (!%p1386_p2), %s1220_s0, 128  }
0x1824   : > { %1630 = vsyncadd (!%p1386_p2), %s1220_s0, 4294967168  ;;  %p18_p4 = scmp.ge.s32.totalorder %s1705_s19, 4   ;;  %s2232_s15 = smov %s1637_s16 }
0x1825   : > { %s2233_s16 = smov %s1641_s17  ;;  %s2234_s17 = smov %s1716_s22 }
0x1826   : > { %s2235_s18 = smov %s1705_s19  ;;  %20 = sbr.rel (!%p18_p4) target bundleno = 8 (0x8), region = 107 }
0x182d   :  { %1225 = vsyncpa [#allocation3], 1 }
0x182e   :  { %1227 = vsyncpa [#allocation3 + $0x1], 1 }
0x182f   :  { %1228 = vsyncpa [#allocation6], 1 }
0x1830   :  { %1229 = vsyncpa [#allocation4], 1 }
0x1831   :  { %1231 = vsyncpa [#allocation4 + $0x1], 1 }

</bundles_post_ra>
